<compile_context>
chip_gen: v7x
topology: tpu7x:2x2x1
jax: 0.10.0
libtpu: 0.0.40
codegen_flags: <defaults>
</compile_context>

<pallas_src>
import functools

import numpy as np
import jax
import jax.numpy as jnp
from jax import lax
from jax.experimental import pallas as pl
from jax.experimental.pallas import tpu as pltpu

_HIGHEST = lax.Precision.HIGHEST


def _round_up(n, m):
    return (n + m - 1) // m * m


# ----------------------------------------------------------------------------
# Fused Pallas kernel: all temporal blocks + concat + CBAM, one launch.
# Grid iterates over batch; each step processes one (C, T) slab in VMEM.
# ----------------------------------------------------------------------------
def _tcn_cbam_kernel(*refs, block_meta):
    it = iter(refs)
    x_ref = next(it)
    per_block = []
    for meta in block_meta:
        w1 = next(it); b1 = next(it); w2 = next(it); b2 = next(it)
        wd = bd = None
        if meta["has_ds"]:
            wd = next(it); bd = next(it)
        per_block.append((w1, b1, w2, b2, wd, bd))
    wa_ref = next(it); ba2_ref = next(it); wb_ref = next(it); bb2_ref = next(it)
    wc_ref = next(it); bc_ref = next(it)          # SMEM: (2,7) taps, (1,1) bias
    o_ref = next(it)

    x = x_ref[0]                                  # (Cin_pad, T)
    T = x.shape[-1]
    lane = lax.broadcasted_iota(jnp.int32, (1, T), 1)

    def dot32(a, b):
        return jnp.dot(a, b, preferred_element_type=jnp.float32, precision=_HIGHEST)

    def conv_k2(h, w_ref_, b_ref_, d):
        # causal dilated k=2 conv: w0 @ h[:, t-d] + w1 @ h[:, t] + b.
        # Shift = XLU lane roll + lane mask (no TxT shift matmul); both taps
        # fused into a single matmul against the stacked [shifted; current] input.
        shifted = jnp.where(lane >= d, pltpu.roll(h, shift=d, axis=1), 0.0)
        stacked = jnp.concatenate([shifted, h], axis=0)        # (2*Cin, T)
        return dot32(w_ref_[...], stacked) + b_ref_[...]

    # ---- TemporalBlocks (weight_norm folded; dropout = identity in eval mode)
    outs = []
    h = x
    for meta, (w1, b1, w2, b2, wd, bd) in zip(block_meta, per_block):
        d = meta["dilation"]
        a1 = jnp.maximum(conv_k2(h, w1, b1, d), 0.0)
        a2 = jnp.maximum(conv_k2(a1, w2, b2, d), 0.0)
        res = dot32(wd[...], h) + bd[...] if meta["has_ds"] else h
        h = jnp.maximum(a2 + res, 0.0)
        outs.append(h)

    xc = jnp.concatenate(outs, axis=0) if len(outs) > 1 else outs[0]   # (C, T)

    # ---- CBAM channel attention
    # No nonlinearity between the two 1x1 convs -> summing over the [avg, max]
    # columns collapses exactly to Wb@(Wa@(avg+max) + 2*ba) + 2*bb.
    s = jnp.mean(xc, axis=1, keepdims=True) + jnp.max(xc, axis=1, keepdims=True)
    hmid = dot32(wa_ref[...], s) + ba2_ref[...]
    ca = jax.nn.sigmoid(dot32(wb_ref[...], hmid) + bb2_ref[...])       # (C, 1)
    x1 = ca * xc

    # ---- CBAM spatial attention: k=7, padding=3 conv as 7 rolled + masked adds
    # Stack [mean; max] once so each tap needs a single XLU roll of a (2, T) slab.
    sp = jnp.concatenate([jnp.mean(xc, axis=0, keepdims=True),
                          jnp.max(xc, axis=0, keepdims=True)], axis=0)  # (2, T)
    sa = jnp.zeros((1, T), jnp.float32) + bc_ref[0, 0]
    for j in range(7):
        sh = 3 - j                                                     # static shift
        rolled = sp if sh == 0 else pltpu.roll(sp, shift=sh % T, axis=1)
        valid = (lane >= sh) & (lane < T + sh)                         # zero padding
        tap = wc_ref[0, j] * rolled[0:1, :] + wc_ref[1, j] * rolled[1:2, :]
        sa = sa + jnp.where(valid, tap, 0.0)
    o_ref[0] = jax.nn.sigmoid(sa) * x1


# ----------------------------------------------------------------------------
# Wrapper: parameter prep (tap fusion, channel padding, 2*bias), specs, grid.
# ----------------------------------------------------------------------------
def tcn_encoder_pallas(x, blocks, cbam_params):
    B, Cin, T = x.shape

    def const_spec(a):
        nd = a.ndim
        return pl.BlockSpec(a.shape, lambda *args, nd=nd: (0,) * nd)

    # Pad the network-input channel count to a sublane multiple so the in-kernel
    # [shifted; current] stack stays (8,128)-aligned (zero channels x zero weights).
    cin_pad = _round_up(Cin, 8)
    xp = jnp.pad(x, ((0, 0), (0, cin_pad - Cin), (0, 0))) if cin_pad != Cin else x

    inputs = [xp]
    in_specs = [pl.BlockSpec((1, cin_pad, T), lambda b: (b, 0, 0))]
    block_meta = []
    in_c, in_c_pad = Cin, cin_pad
    couts = []
    for i, p in enumerate(blocks):
        cout = p["w1"].shape[0]
        # TODO(synk): generalize to non-multiple-of-8 hidden widths by padding block
        # outputs as well; not needed for this configuration.
        assert cout % 8 == 0, "num_channels entries must be multiples of 8"
        has_ds = p["wd"] is not None
        w1, wd = p["w1"], p["wd"]
        if in_c_pad != in_c:
            w1 = jnp.pad(w1, ((0, 0), (0, in_c_pad - in_c), (0, 0)))
            if has_ds:
                wd = jnp.pad(wd, ((0, 0), (0, in_c_pad - in_c)))
        # fused k=2 taps: cols [0:Cin] hit the shifted signal, [Cin:2Cin] the current one
        w1cat = jnp.concatenate([w1[:, :, 0], w1[:, :, 1]], axis=1)
        w2cat = jnp.concatenate([p["w2"][:, :, 0], p["w2"][:, :, 1]], axis=1)
        items = [w1cat, p["b1"][:, None], w2cat, p["b2"][:, None]]
        if has_ds:
            items += [wd, p["bd"][:, None]]
        for a in items:
            inputs.append(a)
            in_specs.append(const_spec(a))
        block_meta.append(dict(dilation=2 ** i, has_ds=has_ds))
        couts.append(cout)
        in_c = in_c_pad = cout

    C = sum(couts)
    wa = cbam_params["wa"][:, :, 0]                 # (C_, C)
    wb = cbam_params["wb"][:, :, 0]                 # (C, C_)
    ba2 = 2.0 * cbam_params["ba"][:, None]          # bias pre-summed over 2 pooled cols
    bb2 = 2.0 * cbam_params["bb"][:, None]
    for a in (wa, ba2, wb, bb2):
        inputs.append(a)
        in_specs.append(const_spec(a))
    wc = cbam_params["wc"][0]                       # (2, 7) spatial taps -> SMEM scalars
    bc = cbam_params["bc"].reshape(1, 1)
    for a in (wc, bc):
        inputs.append(a)
        in_specs.append(pl.BlockSpec(memory_space=pltpu.MemorySpace.SMEM))

    kernel = functools.partial(_tcn_cbam_kernel, block_meta=tuple(block_meta))
    return pl.pallas_call(
        kernel,
        out_shape=jax.ShapeDtypeStruct((B, C, T), jnp.float32),
        grid_spec=pltpu.PrefetchScalarGridSpec(
            num_scalar_prefetch=0,
            grid=(B,),
            in_specs=in_specs,
            out_specs=pl.BlockSpec((1, C, T), lambda b: (b, 0, 0)),
        ),
        compiler_params=pltpu.CompilerParams(
            # batch elements are independent -> lets v7x split them across its 2 cores
            dimension_semantics=("parallel",)),
    )(*inputs)


# ----------------------------------------------------------------------------
# Pure-JAX reference (mirrors the PyTorch forward, eval mode)
# ----------------------------------------------------------------------------
def _conv_causal_ref(x, w, b, dilation):
    Bn, Cin, T = x.shape
    xs = jnp.pad(x, ((0, 0), (0, 0), (dilation, 0)))[:, :, :T]
    return (jnp.einsum("oi,bit->bot", w[:, :, 0], xs, precision=_HIGHEST)
            + jnp.einsum("oi,bit->bot", w[:, :, 1], x, precision=_HIGHEST)
            + b[None, :, None])


def _cbam_ref(x, p):
    Bn, C, T = x.shape
    avg = jnp.mean(x, axis=2, keepdims=True)
    mx = jnp.max(x, axis=2, keepdims=True)
    ca_in = jnp.concatenate([avg, mx], axis=2)                  # (B, C, 2)
    wa, wb = p["wa"][:, :, 0], p["wb"][:, :, 0]
    h = jnp.einsum("oi,bit->bot", wa, ca_in, precision=_HIGHEST) + p["ba"][None, :, None]
    m = jnp.einsum("oi,bit->bot", wb, h, precision=_HIGHEST) + p["bb"][None, :, None]
    ca = jax.nn.sigmoid(jnp.sum(m, axis=2, keepdims=True))
    x1 = ca * x
    mean_c = jnp.mean(x, axis=1, keepdims=True)
    max_c = jnp.max(x, axis=1, keepdims=True)
    sp = jnp.concatenate([mean_c, max_c], axis=1)               # (B, 2, T)
    sp_pad = jnp.pad(sp, ((0, 0), (0, 0), (3, 3)))
    wc = p["wc"][0]                                             # (2, 7)
    sa_logit = jnp.zeros((Bn, T), jnp.float32)
    for j in range(7):
        sa_logit = sa_logit + jnp.einsum("c,bct->bt", wc[:, j], sp_pad[:, :, j:j + T],
                                         precision=_HIGHEST)
    sa = jax.nn.sigmoid(sa_logit + p["bc"][0])[:, None, :]
    return sa * x1


def tcn_encoder_ref(x, blocks, cbam_params):
    outs = []
    h = x
    for i, p in enumerate(blocks):
        d = 2 ** i
        h1 = jax.nn.relu(_conv_causal_ref(h, p["w1"], p["b1"], d))
        h2 = jax.nn.relu(_conv_causal_ref(h1, p["w2"], p["b2"], d))
        if p["wd"] is None:
            res = h
        else:
            res = jnp.einsum("oi,bit->bot", p["wd"], h, precision=_HIGHEST) \
                + p["bd"][None, :, None]
        h = jax.nn.relu(h2 + res)
        outs.append(h)
    out = jnp.concatenate(outs, axis=1)
    return _cbam_ref(out, cbam_params)


# ----------------------------------------------------------------------------
# Deterministic synthetic parameters + run
# ----------------------------------------------------------------------------
def _init_conv(key, cout, cin, k):
    k1, k2 = jax.random.split(key)
    scale = 1.0 / np.sqrt(cin * k)
    w = scale * jax.random.normal(k1, (cout, cin, k), jnp.float32)
    b = scale * jax.random.normal(k2, (cout,), jnp.float32)
    return w, b


def _weight_norm_fold(v, g):
    # PyTorch weight_norm(dim=0): w = g * v / ||v||, norm over all dims except dim 0.
    norm = jnp.sqrt(jnp.sum(v * v, axis=tuple(range(1, v.ndim)), keepdims=True))
    return (g.reshape((-1,) + (1,) * (v.ndim - 1)) / norm) * v


if __name__ == "__main__":
    B, T = 2, 128
    num_inputs = 12
    num_channels = [16, 16]
    se_reduction = 16

    keys = jax.random.split(jax.random.PRNGKey(0), 20)
    kidx = 0

    blocks = []
    in_c = num_inputs
    for i, out_c in enumerate(num_channels):
        v1, b1 = _init_conv(keys[kidx], out_c, in_c, 2); kidx += 1
        g1 = jax.random.uniform(keys[kidx], (out_c,), jnp.float32, 0.5, 1.5); kidx += 1
        v2, b2 = _init_conv(keys[kidx], out_c, out_c, 2); kidx += 1
        g2 = jax.random.uniform(keys[kidx], (out_c,), jnp.float32, 0.5, 1.5); kidx += 1
        w1 = _weight_norm_fold(v1, g1)     # weight_norm reparametrization folded in
        w2 = _weight_norm_fold(v2, g2)
        if in_c != out_c:
            wd3, bd = _init_conv(keys[kidx], out_c, in_c, 1); kidx += 1
            wd = wd3[:, :, 0]
        else:
            wd, bd = None, None
        blocks.append(dict(w1=w1, b1=b1, w2=w2, b2=b2, wd=wd, bd=bd))
        in_c = out_c

    C = sum(num_channels)
    c_ = C // se_reduction
    wa, ba = _init_conv(keys[kidx], c_, C, 1); kidx += 1
    wb, bb = _init_conv(keys[kidx], C, c_, 1); kidx += 1
    wc, bc = _init_conv(keys[kidx], 1, 2, 7); kidx += 1
    cbam_params = dict(wa=wa, ba=ba, wb=wb, bb=bb, wc=wc, bc=bc)

    x = jax.random.normal(keys[kidx], (B, num_inputs, T), jnp.float32)

    out = jax.block_until_ready(tcn_encoder_pallas(x, blocks, cbam_params))
    ref = jax.block_until_ready(tcn_encoder_ref(x, blocks, cbam_params))

    assert out.shape == (B, C, T), out.shape
    err = float(jnp.max(jnp.abs(out - ref)))
    # Both sides use HIGHEST matmul precision; expected error ~1e-5.
    assert err < 1e-3, f"max abs error too large: {err}"
    print("KERNEL_OK")
</pallas_src>

<mosaic_0001>
module attributes {stable_mosaic.version = 11 : i64} {
  func.func @_tcn_cbam_kernel(%arg0: i32, %arg1: memref<1x16x128xf32, #tpu.memory_space<vmem>>, %arg2: memref<16x32xf32, #tpu.memory_space<vmem>>, %arg3: memref<16x1xf32, #tpu.memory_space<vmem>>, %arg4: memref<16x32xf32, #tpu.memory_space<vmem>>, %arg5: memref<16x1xf32, #tpu.memory_space<vmem>>, %arg6: memref<16x16xf32, #tpu.memory_space<vmem>>, %arg7: memref<16x1xf32, #tpu.memory_space<vmem>>, %arg8: memref<16x32xf32, #tpu.memory_space<vmem>>, %arg9: memref<16x1xf32, #tpu.memory_space<vmem>>, %arg10: memref<16x32xf32, #tpu.memory_space<vmem>>, %arg11: memref<16x1xf32, #tpu.memory_space<vmem>>, %arg12: memref<2x32xf32, #tpu.memory_space<vmem>>, %arg13: memref<2x1xf32, #tpu.memory_space<vmem>>, %arg14: memref<32x2xf32, #tpu.memory_space<vmem>>, %arg15: memref<32x1xf32, #tpu.memory_space<vmem>>, %arg16: memref<2x7xf32, #tpu.memory_space<smem>>, %arg17: memref<1x1xf32, #tpu.memory_space<smem>>, %arg18: memref<1x32x128xf32, #tpu.memory_space<vmem>>) attributes {dimension_semantics = [#tpu.dimension_semantics<parallel>], iteration_bounds = array<i64: 2>, scalar_prefetch = 0 : i64, scratch_operands = 0 : i64, tpu.core_type = #tpu.core_type<tc>, window_params = [{transform_indices = @transform_0, window_bounds = array<i64: 1, 16, 128>}, {pipeline_mode = #tpu.pipeline_mode<synchronous>, transform_indices = @transform_1, window_bounds = array<i64: 16, 32>}, {pipeline_mode = #tpu.pipeline_mode<synchronous>, transform_indices = @transform_2, window_bounds = array<i64: 16, 1>}, {pipeline_mode = #tpu.pipeline_mode<synchronous>, transform_indices = @transform_3, window_bounds = array<i64: 16, 32>}, {pipeline_mode = #tpu.pipeline_mode<synchronous>, transform_indices = @transform_4, window_bounds = array<i64: 16, 1>}, {pipeline_mode = #tpu.pipeline_mode<synchronous>, transform_indices = @transform_5, window_bounds = array<i64: 16, 16>}, {pipeline_mode = #tpu.pipeline_mode<synchronous>, transform_indices = @transform_6, window_bounds = array<i64: 16, 1>}, {pipeline_mode = #tpu.pipeline_mode<synchronous>, transform_indices = @transform_7, window_bounds = array<i64: 16, 32>}, {pipeline_mode = #tpu.pipeline_mode<synchronous>, transform_indices = @transform_8, window_bounds = array<i64: 16, 1>}, {pipeline_mode = #tpu.pipeline_mode<synchronous>, transform_indices = @transform_9, window_bounds = array<i64: 16, 32>}, {pipeline_mode = #tpu.pipeline_mode<synchronous>, transform_indices = @transform_10, window_bounds = array<i64: 16, 1>}, {pipeline_mode = #tpu.pipeline_mode<synchronous>, transform_indices = @transform_11, window_bounds = array<i64: 2, 32>}, {pipeline_mode = #tpu.pipeline_mode<synchronous>, transform_indices = @transform_12, window_bounds = array<i64: 2, 1>}, {pipeline_mode = #tpu.pipeline_mode<synchronous>, transform_indices = @transform_13, window_bounds = array<i64: 32, 2>}, {pipeline_mode = #tpu.pipeline_mode<synchronous>, transform_indices = @transform_14, window_bounds = array<i64: 32, 1>}, {transform_indices = @transform_15, window_bounds = array<i64: 2, 7>}, {transform_indices = @transform_16, window_bounds = array<i64: 1, 1>}, {transform_indices = @transform_17, window_bounds = array<i64: 1, 32, 128>}]} {
    %c0 = arith.constant 0 : index
    %c0_0 = arith.constant 0 : index
    %c0_1 = arith.constant 0 : index
    %0 = vector.load %arg1[%c0, %c0_0, %c0_1] : memref<1x16x128xf32, #tpu.memory_space<vmem>>, vector<1x16x128xf32>
    %1 = vector.shape_cast %0 : vector<1x16x128xf32> to vector<16x128xf32>
    %2 = tpu.iota {dimensions = array<i32: 1>} : vector<1x128xi32>
    %c1_i32 = arith.constant 1 : i32
    %3 = vector.broadcast %c1_i32 : i32 to vector<1x128xi32>
    %4 = arith.cmpi sge, %2, %3 : vector<1x128xi32>
    %c1_i32_2 = arith.constant 1 : i32
    %5 = tpu.dynamic_rotate %1 by %c1_i32_2 dim 1 : vector<16x128xf32>, i32 -> vector<16x128xf32>
    %cst = arith.constant 0.000000e+00 : f32
    %6 = vector.shape_cast %4 : vector<1x128xi1> to vector<1x128xi1>
    %7 = vector.broadcast %6 : vector<1x128xi1> to vector<16x128xi1>
    %8 = vector.broadcast %cst : f32 to vector<16x128xf32>
    %9 = arith.select %7, %5, %8 : vector<16x128xi1>, vector<16x128xf32>
    %10 = tpu.concatenate %9, %1 in 0 : vector<16x128xf32>, vector<16x128xf32> -> vector<32x128xf32>
    %c0_3 = arith.constant 0 : index
    %c0_4 = arith.constant 0 : index
    %11 = vector.load %arg2[%c0_3, %c0_4] : memref<16x32xf32, #tpu.memory_space<vmem>>, vector<16x32xf32>
    %cst_5 = arith.constant dense<0.000000e+00> : vector<16x128xf32>
    %12 = tpu.matmul %11, %10, %cst_5 {dimension_numbers = #tpu.dot_dimension_numbers<[1], [0], [0], [1], [0, 0, 1, 1], [], []>, precision = #tpu.contract_precision<fp32>} : vector<16x32xf32>, vector<32x128xf32>, vector<16x128xf32> -> vector<16x128xf32>
    %c0_6 = arith.constant 0 : index
    %c0_7 = arith.constant 0 : index
    %13 = vector.load %arg3[%c0_6, %c0_7] : memref<16x1xf32, #tpu.memory_space<vmem>>, vector<16x1xf32>
    %14 = vector.broadcast %13 : vector<16x1xf32> to vector<16x128xf32>
    %15 = arith.addf %12, %14 : vector<16x128xf32>
    %cst_8 = arith.constant 0.000000e+00 : f32
    %16 = vector.broadcast %cst_8 : f32 to vector<16x128xf32>
    %17 = arith.maximumf %15, %16 : vector<16x128xf32>
    %c1_i32_9 = arith.constant 1 : i32
    %18 = vector.broadcast %c1_i32_9 : i32 to vector<1x128xi32>
    %19 = arith.cmpi sge, %2, %18 : vector<1x128xi32>
    %c1_i32_10 = arith.constant 1 : i32
    %20 = tpu.dynamic_rotate %17 by %c1_i32_10 dim 1 : vector<16x128xf32>, i32 -> vector<16x128xf32>
    %cst_11 = arith.constant 0.000000e+00 : f32
    %21 = vector.shape_cast %19 : vector<1x128xi1> to vector<1x128xi1>
    %22 = vector.broadcast %21 : vector<1x128xi1> to vector<16x128xi1>
    %23 = vector.broadcast %cst_11 : f32 to vector<16x128xf32>
    %24 = arith.select %22, %20, %23 : vector<16x128xi1>, vector<16x128xf32>
    %25 = tpu.concatenate %24, %17 in 0 : vector<16x128xf32>, vector<16x128xf32> -> vector<32x128xf32>
    %c0_12 = arith.constant 0 : index
    %c0_13 = arith.constant 0 : index
    %26 = vector.load %arg4[%c0_12, %c0_13] : memref<16x32xf32, #tpu.memory_space<vmem>>, vector<16x32xf32>
    %cst_14 = arith.constant dense<0.000000e+00> : vector<16x128xf32>
    %27 = tpu.matmul %26, %25, %cst_14 {dimension_numbers = #tpu.dot_dimension_numbers<[1], [0], [0], [1], [0, 0, 1, 1], [], []>, precision = #tpu.contract_precision<fp32>} : vector<16x32xf32>, vector<32x128xf32>, vector<16x128xf32> -> vector<16x128xf32>
    %c0_15 = arith.constant 0 : index
    %c0_16 = arith.constant 0 : index
    %28 = vector.load %arg5[%c0_15, %c0_16] : memref<16x1xf32, #tpu.memory_space<vmem>>, vector<16x1xf32>
    %29 = vector.broadcast %28 : vector<16x1xf32> to vector<16x128xf32>
    %30 = arith.addf %27, %29 : vector<16x128xf32>
    %cst_17 = arith.constant 0.000000e+00 : f32
    %31 = vector.broadcast %cst_17 : f32 to vector<16x128xf32>
    %32 = arith.maximumf %30, %31 : vector<16x128xf32>
    %c0_18 = arith.constant 0 : index
    %c0_19 = arith.constant 0 : index
    %33 = vector.load %arg6[%c0_18, %c0_19] : memref<16x16xf32, #tpu.memory_space<vmem>>, vector<16x16xf32>
    %cst_20 = arith.constant dense<0.000000e+00> : vector<16x128xf32>
    %34 = tpu.matmul %33, %1, %cst_20 {dimension_numbers = #tpu.dot_dimension_numbers<[1], [0], [0], [1], [0, 0, 1, 1], [], []>, precision = #tpu.contract_precision<fp32>} : vector<16x16xf32>, vector<16x128xf32>, vector<16x128xf32> -> vector<16x128xf32>
    %c0_21 = arith.constant 0 : index
    %c0_22 = arith.constant 0 : index
    %35 = vector.load %arg7[%c0_21, %c0_22] : memref<16x1xf32, #tpu.memory_space<vmem>>, vector<16x1xf32>
    %36 = vector.broadcast %35 : vector<16x1xf32> to vector<16x128xf32>
    %37 = arith.addf %34, %36 : vector<16x128xf32>
    %38 = arith.addf %32, %37 : vector<16x128xf32>
    %cst_23 = arith.constant 0.000000e+00 : f32
    %39 = vector.broadcast %cst_23 : f32 to vector<16x128xf32>
    %40 = arith.maximumf %38, %39 : vector<16x128xf32>
    %c2_i32 = arith.constant 2 : i32
    %41 = vector.broadcast %c2_i32 : i32 to vector<1x128xi32>
    %42 = arith.cmpi sge, %2, %41 : vector<1x128xi32>
    %c2_i32_24 = arith.constant 2 : i32
    %43 = tpu.dynamic_rotate %40 by %c2_i32_24 dim 1 : vector<16x128xf32>, i32 -> vector<16x128xf32>
    %cst_25 = arith.constant 0.000000e+00 : f32
    %44 = vector.shape_cast %42 : vector<1x128xi1> to vector<1x128xi1>
    %45 = vector.broadcast %44 : vector<1x128xi1> to vector<16x128xi1>
    %46 = vector.broadcast %cst_25 : f32 to vector<16x128xf32>
    %47 = arith.select %45, %43, %46 : vector<16x128xi1>, vector<16x128xf32>
    %48 = tpu.concatenate %47, %40 in 0 : vector<16x128xf32>, vector<16x128xf32> -> vector<32x128xf32>
    %c0_26 = arith.constant 0 : index
    %c0_27 = arith.constant 0 : index
    %49 = vector.load %arg8[%c0_26, %c0_27] : memref<16x32xf32, #tpu.memory_space<vmem>>, vector<16x32xf32>
    %cst_28 = arith.constant dense<0.000000e+00> : vector<16x128xf32>
    %50 = tpu.matmul %49, %48, %cst_28 {dimension_numbers = #tpu.dot_dimension_numbers<[1], [0], [0], [1], [0, 0, 1, 1], [], []>, precision = #tpu.contract_precision<fp32>} : vector<16x32xf32>, vector<32x128xf32>, vector<16x128xf32> -> vector<16x128xf32>
    %c0_29 = arith.constant 0 : index
    %c0_30 = arith.constant 0 : index
    %51 = vector.load %arg9[%c0_29, %c0_30] : memref<16x1xf32, #tpu.memory_space<vmem>>, vector<16x1xf32>
    %52 = vector.broadcast %51 : vector<16x1xf32> to vector<16x128xf32>
    %53 = arith.addf %50, %52 : vector<16x128xf32>
    %cst_31 = arith.constant 0.000000e+00 : f32
    %54 = vector.broadcast %cst_31 : f32 to vector<16x128xf32>
    %55 = arith.maximumf %53, %54 : vector<16x128xf32>
    %c2_i32_32 = arith.constant 2 : i32
    %56 = vector.broadcast %c2_i32_32 : i32 to vector<1x128xi32>
    %57 = arith.cmpi sge, %2, %56 : vector<1x128xi32>
    %c2_i32_33 = arith.constant 2 : i32
    %58 = tpu.dynamic_rotate %55 by %c2_i32_33 dim 1 : vector<16x128xf32>, i32 -> vector<16x128xf32>
    %cst_34 = arith.constant 0.000000e+00 : f32
    %59 = vector.shape_cast %57 : vector<1x128xi1> to vector<1x128xi1>
    %60 = vector.broadcast %59 : vector<1x128xi1> to vector<16x128xi1>
    %61 = vector.broadcast %cst_34 : f32 to vector<16x128xf32>
    %62 = arith.select %60, %58, %61 : vector<16x128xi1>, vector<16x128xf32>
    %63 = tpu.concatenate %62, %55 in 0 : vector<16x128xf32>, vector<16x128xf32> -> vector<32x128xf32>
    %c0_35 = arith.constant 0 : index
    %c0_36 = arith.constant 0 : index
    %64 = vector.load %arg10[%c0_35, %c0_36] : memref<16x32xf32, #tpu.memory_space<vmem>>, vector<16x32xf32>
    %cst_37 = arith.constant dense<0.000000e+00> : vector<16x128xf32>
    %65 = tpu.matmul %64, %63, %cst_37 {dimension_numbers = #tpu.dot_dimension_numbers<[1], [0], [0], [1], [0, 0, 1, 1], [], []>, precision = #tpu.contract_precision<fp32>} : vector<16x32xf32>, vector<32x128xf32>, vector<16x128xf32> -> vector<16x128xf32>
    %c0_38 = arith.constant 0 : index
    %c0_39 = arith.constant 0 : index
    %66 = vector.load %arg11[%c0_38, %c0_39] : memref<16x1xf32, #tpu.memory_space<vmem>>, vector<16x1xf32>
    %67 = vector.broadcast %66 : vector<16x1xf32> to vector<16x128xf32>
    %68 = arith.addf %65, %67 : vector<16x128xf32>
    %cst_40 = arith.constant 0.000000e+00 : f32
    %69 = vector.broadcast %cst_40 : f32 to vector<16x128xf32>
    %70 = arith.maximumf %68, %69 : vector<16x128xf32>
    %71 = arith.addf %70, %40 : vector<16x128xf32>
    %cst_41 = arith.constant 0.000000e+00 : f32
    %72 = vector.broadcast %cst_41 : f32 to vector<16x128xf32>
    %73 = arith.maximumf %71, %72 : vector<16x128xf32>
    %74 = tpu.concatenate %40, %73 in 0 : vector<16x128xf32>, vector<16x128xf32> -> vector<32x128xf32>
    %cst_42 = arith.constant dense<0.000000e+00> : vector<32xf32>
    %75 = vector.multi_reduction <add>, %74, %cst_42 [1] : vector<32x128xf32> to vector<32xf32>
    %76 = vector.shape_cast %75 : vector<32xf32> to vector<32x1xf32>
    %cst_43 = arith.constant 1.280000e+02 : f32
    %77 = vector.broadcast %cst_43 : f32 to vector<32x1xf32>
    %78 = arith.divf %76, %77 : vector<32x1xf32>
    %cst_44 = arith.constant dense<0xFF800000> : vector<32xf32>
    %79 = vector.multi_reduction <maximumf>, %74, %cst_44 [1] : vector<32x128xf32> to vector<32xf32>
    %80 = vector.shape_cast %79 : vector<32xf32> to vector<32x1xf32>
    %81 = arith.addf %78, %80 : vector<32x1xf32>
    %c0_45 = arith.constant 0 : index
    %c0_46 = arith.constant 0 : index
    %82 = vector.load %arg12[%c0_45, %c0_46] : memref<2x32xf32, #tpu.memory_space<vmem>>, vector<2x32xf32>
    %cst_47 = arith.constant dense<0.000000e+00> : vector<2x1xf32>
    %83 = tpu.matmul %82, %81, %cst_47 {dimension_numbers = #tpu.dot_dimension_numbers<[1], [0], [0], [1], [0, 0, 1, 1], [], []>, precision = #tpu.contract_precision<fp32>} : vector<2x32xf32>, vector<32x1xf32>, vector<2x1xf32> -> vector<2x1xf32>
    %c0_48 = arith.constant 0 : index
    %c0_49 = arith.constant 0 : index
    %84 = vector.load %arg13[%c0_48, %c0_49] : memref<2x1xf32, #tpu.memory_space<vmem>>, vector<2x1xf32>
    %85 = arith.addf %83, %84 : vector<2x1xf32>
    %c0_50 = arith.constant 0 : index
    %c0_51 = arith.constant 0 : index
    %86 = vector.load %arg14[%c0_50, %c0_51] : memref<32x2xf32, #tpu.memory_space<vmem>>, vector<32x2xf32>
    %cst_52 = arith.constant dense<0.000000e+00> : vector<32x1xf32>
    %87 = tpu.matmul %86, %85, %cst_52 {dimension_numbers = #tpu.dot_dimension_numbers<[1], [0], [0], [1], [0, 0, 1, 1], [], []>, precision = #tpu.contract_precision<fp32>} : vector<32x2xf32>, vector<2x1xf32>, vector<32x1xf32> -> vector<32x1xf32>
    %c0_53 = arith.constant 0 : index
    %c0_54 = arith.constant 0 : index
    %88 = vector.load %arg15[%c0_53, %c0_54] : memref<32x1xf32, #tpu.memory_space<vmem>>, vector<32x1xf32>
    %89 = arith.addf %87, %88 : vector<32x1xf32>
    %90 = arith.negf %89 : vector<32x1xf32>
    %91 = math.exp %90 : vector<32x1xf32>
    %cst_55 = arith.constant 1.000000e+00 : f32
    %92 = vector.broadcast %cst_55 : f32 to vector<32x1xf32>
    %93 = arith.addf %92, %91 : vector<32x1xf32>
    %94 = arith.divf %92, %93 : vector<32x1xf32>
    %95 = vector.broadcast %94 : vector<32x1xf32> to vector<32x128xf32>
    %96 = arith.mulf %95, %74 : vector<32x128xf32>
    %cst_56 = arith.constant dense<0.000000e+00> : vector<128xf32>
    %97 = vector.multi_reduction <add>, %74, %cst_56 [0] : vector<32x128xf32> to vector<128xf32>
    %98 = vector.shape_cast %97 : vector<128xf32> to vector<1x128xf32>
    %cst_57 = arith.constant 3.200000e+01 : f32
    %99 = vector.broadcast %cst_57 : f32 to vector<1x128xf32>
    %100 = arith.divf %98, %99 : vector<1x128xf32>
    %cst_58 = arith.constant dense<0xFF800000> : vector<128xf32>
    %101 = vector.multi_reduction <maximumf>, %74, %cst_58 [0] : vector<32x128xf32> to vector<128xf32>
    %102 = vector.shape_cast %101 : vector<128xf32> to vector<1x128xf32>
    %103 = tpu.concatenate %100, %102 in 0 : vector<1x128xf32>, vector<1x128xf32> -> vector<2x128xf32>
    %cst_59 = arith.constant 0.000000e+00 : f32
    %104 = vector.broadcast %cst_59 : f32 to vector<1x128xf32>
    %c0_60 = arith.constant 0 : index
    %c0_61 = arith.constant 0 : index
    %105 = memref.load %arg17[%c0_60, %c0_61] : memref<1x1xf32, #tpu.memory_space<smem>>
    %106 = vector.broadcast %105 : f32 to vector<1x128xf32>
    %107 = arith.addf %104, %106 : vector<1x128xf32>
    %c3_i32 = arith.constant 3 : i32
    %108 = tpu.dynamic_rotate %103 by %c3_i32 dim 1 : vector<2x128xf32>, i32 -> vector<2x128xf32>
    %c3_i32_62 = arith.constant 3 : i32
    %109 = vector.broadcast %c3_i32_62 : i32 to vector<1x128xi32>
    %110 = arith.cmpi sge, %2, %109 : vector<1x128xi32>
    %c131_i32 = arith.constant 131 : i32
    %111 = vector.broadcast %c131_i32 : i32 to vector<1x128xi32>
    %112 = arith.cmpi slt, %2, %111 : vector<1x128xi32>
    %113 = arith.andi %110, %112 : vector<1x128xi1>
    %c0_63 = arith.constant 0 : index
    %c0_64 = arith.constant 0 : index
    %114 = memref.load %arg16[%c0_63, %c0_64] : memref<2x7xf32, #tpu.memory_space<smem>>
    %115 = vector.extract_strided_slice %108 {offsets = [0, 0], sizes = [1, 128], strides = [1, 1]} : vector<2x128xf32> to vector<1x128xf32>
    %116 = vector.broadcast %114 : f32 to vector<1x128xf32>
    %117 = arith.mulf %116, %115 : vector<1x128xf32>
    %c1 = arith.constant 1 : index
    %c0_65 = arith.constant 0 : index
    %118 = memref.load %arg16[%c1, %c0_65] : memref<2x7xf32, #tpu.memory_space<smem>>
    %119 = vector.extract_strided_slice %108 {offsets = [1, 0], sizes = [1, 128], strides = [1, 1]} : vector<2x128xf32> to vector<1x128xf32>
    %120 = vector.broadcast %118 : f32 to vector<1x128xf32>
    %121 = arith.mulf %120, %119 : vector<1x128xf32>
    %122 = arith.addf %117, %121 : vector<1x128xf32>
    %cst_66 = arith.constant 0.000000e+00 : f32
    %123 = vector.broadcast %cst_66 : f32 to vector<1x128xf32>
    %124 = arith.select %113, %122, %123 : vector<1x128xi1>, vector<1x128xf32>
    %125 = arith.addf %107, %124 : vector<1x128xf32>
    %c2_i32_67 = arith.constant 2 : i32
    %126 = tpu.dynamic_rotate %103 by %c2_i32_67 dim 1 : vector<2x128xf32>, i32 -> vector<2x128xf32>
    %c2_i32_68 = arith.constant 2 : i32
    %127 = vector.broadcast %c2_i32_68 : i32 to vector<1x128xi32>
    %128 = arith.cmpi sge, %2, %127 : vector<1x128xi32>
    %c130_i32 = arith.constant 130 : i32
    %129 = vector.broadcast %c130_i32 : i32 to vector<1x128xi32>
    %130 = arith.cmpi slt, %2, %129 : vector<1x128xi32>
    %131 = arith.andi %128, %130 : vector<1x128xi1>
    %c0_69 = arith.constant 0 : index
    %c1_70 = arith.constant 1 : index
    %132 = memref.load %arg16[%c0_69, %c1_70] : memref<2x7xf32, #tpu.memory_space<smem>>
    %133 = vector.extract_strided_slice %126 {offsets = [0, 0], sizes = [1, 128], strides = [1, 1]} : vector<2x128xf32> to vector<1x128xf32>
    %134 = vector.broadcast %132 : f32 to vector<1x128xf32>
    %135 = arith.mulf %134, %133 : vector<1x128xf32>
    %c1_71 = arith.constant 1 : index
    %c1_72 = arith.constant 1 : index
    %136 = memref.load %arg16[%c1_71, %c1_72] : memref<2x7xf32, #tpu.memory_space<smem>>
    %137 = vector.extract_strided_slice %126 {offsets = [1, 0], sizes = [1, 128], strides = [1, 1]} : vector<2x128xf32> to vector<1x128xf32>
    %138 = vector.broadcast %136 : f32 to vector<1x128xf32>
    %139 = arith.mulf %138, %137 : vector<1x128xf32>
    %140 = arith.addf %135, %139 : vector<1x128xf32>
    %cst_73 = arith.constant 0.000000e+00 : f32
    %141 = vector.broadcast %cst_73 : f32 to vector<1x128xf32>
    %142 = arith.select %131, %140, %141 : vector<1x128xi1>, vector<1x128xf32>
    %143 = arith.addf %125, %142 : vector<1x128xf32>
    %c1_i32_74 = arith.constant 1 : i32
    %144 = tpu.dynamic_rotate %103 by %c1_i32_74 dim 1 : vector<2x128xf32>, i32 -> vector<2x128xf32>
    %c1_i32_75 = arith.constant 1 : i32
    %145 = vector.broadcast %c1_i32_75 : i32 to vector<1x128xi32>
    %146 = arith.cmpi sge, %2, %145 : vector<1x128xi32>
    %c129_i32 = arith.constant 129 : i32
    %147 = vector.broadcast %c129_i32 : i32 to vector<1x128xi32>
    %148 = arith.cmpi slt, %2, %147 : vector<1x128xi32>
    %149 = arith.andi %146, %148 : vector<1x128xi1>
    %c0_76 = arith.constant 0 : index
    %c2 = arith.constant 2 : index
    %150 = memref.load %arg16[%c0_76, %c2] : memref<2x7xf32, #tpu.memory_space<smem>>
    %151 = vector.extract_strided_slice %144 {offsets = [0, 0], sizes = [1, 128], strides = [1, 1]} : vector<2x128xf32> to vector<1x128xf32>
    %152 = vector.broadcast %150 : f32 to vector<1x128xf32>
    %153 = arith.mulf %152, %151 : vector<1x128xf32>
    %c1_77 = arith.constant 1 : index
    %c2_78 = arith.constant 2 : index
    %154 = memref.load %arg16[%c1_77, %c2_78] : memref<2x7xf32, #tpu.memory_space<smem>>
    %155 = vector.extract_strided_slice %144 {offsets = [1, 0], sizes = [1, 128], strides = [1, 1]} : vector<2x128xf32> to vector<1x128xf32>
    %156 = vector.broadcast %154 : f32 to vector<1x128xf32>
    %157 = arith.mulf %156, %155 : vector<1x128xf32>
    %158 = arith.addf %153, %157 : vector<1x128xf32>
    %cst_79 = arith.constant 0.000000e+00 : f32
    %159 = vector.broadcast %cst_79 : f32 to vector<1x128xf32>
    %160 = arith.select %149, %158, %159 : vector<1x128xi1>, vector<1x128xf32>
    %161 = arith.addf %143, %160 : vector<1x128xf32>
    %c0_i32 = arith.constant 0 : i32
    %162 = vector.broadcast %c0_i32 : i32 to vector<1x128xi32>
    %163 = arith.cmpi sge, %2, %162 : vector<1x128xi32>
    %c128_i32 = arith.constant 128 : i32
    %164 = vector.broadcast %c128_i32 : i32 to vector<1x128xi32>
    %165 = arith.cmpi slt, %2, %164 : vector<1x128xi32>
    %166 = arith.andi %163, %165 : vector<1x128xi1>
    %c0_80 = arith.constant 0 : index
    %c3 = arith.constant 3 : index
    %167 = memref.load %arg16[%c0_80, %c3] : memref<2x7xf32, #tpu.memory_space<smem>>
    %168 = vector.extract_strided_slice %103 {offsets = [0, 0], sizes = [1, 128], strides = [1, 1]} : vector<2x128xf32> to vector<1x128xf32>
    %169 = vector.broadcast %167 : f32 to vector<1x128xf32>
    %170 = arith.mulf %169, %168 : vector<1x128xf32>
    %c1_81 = arith.constant 1 : index
    %c3_82 = arith.constant 3 : index
    %171 = memref.load %arg16[%c1_81, %c3_82] : memref<2x7xf32, #tpu.memory_space<smem>>
    %172 = vector.extract_strided_slice %103 {offsets = [1, 0], sizes = [1, 128], strides = [1, 1]} : vector<2x128xf32> to vector<1x128xf32>
    %173 = vector.broadcast %171 : f32 to vector<1x128xf32>
    %174 = arith.mulf %173, %172 : vector<1x128xf32>
    %175 = arith.addf %170, %174 : vector<1x128xf32>
    %cst_83 = arith.constant 0.000000e+00 : f32
    %176 = vector.broadcast %cst_83 : f32 to vector<1x128xf32>
    %177 = arith.select %166, %175, %176 : vector<1x128xi1>, vector<1x128xf32>
    %178 = arith.addf %161, %177 : vector<1x128xf32>
    %c127_i32 = arith.constant 127 : i32
    %179 = tpu.dynamic_rotate %103 by %c127_i32 dim 1 : vector<2x128xf32>, i32 -> vector<2x128xf32>
    %c-1_i32 = arith.constant -1 : i32
    %180 = vector.broadcast %c-1_i32 : i32 to vector<1x128xi32>
    %181 = arith.cmpi sge, %2, %180 : vector<1x128xi32>
    %c127_i32_84 = arith.constant 127 : i32
    %182 = vector.broadcast %c127_i32_84 : i32 to vector<1x128xi32>
    %183 = arith.cmpi slt, %2, %182 : vector<1x128xi32>
    %184 = arith.andi %181, %183 : vector<1x128xi1>
    %c0_85 = arith.constant 0 : index
    %c4 = arith.constant 4 : index
    %185 = memref.load %arg16[%c0_85, %c4] : memref<2x7xf32, #tpu.memory_space<smem>>
    %186 = vector.extract_strided_slice %179 {offsets = [0, 0], sizes = [1, 128], strides = [1, 1]} : vector<2x128xf32> to vector<1x128xf32>
    %187 = vector.broadcast %185 : f32 to vector<1x128xf32>
    %188 = arith.mulf %187, %186 : vector<1x128xf32>
    %c1_86 = arith.constant 1 : index
    %c4_87 = arith.constant 4 : index
    %189 = memref.load %arg16[%c1_86, %c4_87] : memref<2x7xf32, #tpu.memory_space<smem>>
    %190 = vector.extract_strided_slice %179 {offsets = [1, 0], sizes = [1, 128], strides = [1, 1]} : vector<2x128xf32> to vector<1x128xf32>
    %191 = vector.broadcast %189 : f32 to vector<1x128xf32>
    %192 = arith.mulf %191, %190 : vector<1x128xf32>
    %193 = arith.addf %188, %192 : vector<1x128xf32>
    %cst_88 = arith.constant 0.000000e+00 : f32
    %194 = vector.broadcast %cst_88 : f32 to vector<1x128xf32>
    %195 = arith.select %184, %193, %194 : vector<1x128xi1>, vector<1x128xf32>
    %196 = arith.addf %178, %195 : vector<1x128xf32>
    %c126_i32 = arith.constant 126 : i32
    %197 = tpu.dynamic_rotate %103 by %c126_i32 dim 1 : vector<2x128xf32>, i32 -> vector<2x128xf32>
    %c-2_i32 = arith.constant -2 : i32
    %198 = vector.broadcast %c-2_i32 : i32 to vector<1x128xi32>
    %199 = arith.cmpi sge, %2, %198 : vector<1x128xi32>
    %c126_i32_89 = arith.constant 126 : i32
    %200 = vector.broadcast %c126_i32_89 : i32 to vector<1x128xi32>
    %201 = arith.cmpi slt, %2, %200 : vector<1x128xi32>
    %202 = arith.andi %199, %201 : vector<1x128xi1>
    %c0_90 = arith.constant 0 : index
    %c5 = arith.constant 5 : index
    %203 = memref.load %arg16[%c0_90, %c5] : memref<2x7xf32, #tpu.memory_space<smem>>
    %204 = vector.extract_strided_slice %197 {offsets = [0, 0], sizes = [1, 128], strides = [1, 1]} : vector<2x128xf32> to vector<1x128xf32>
    %205 = vector.broadcast %203 : f32 to vector<1x128xf32>
    %206 = arith.mulf %205, %204 : vector<1x128xf32>
    %c1_91 = arith.constant 1 : index
    %c5_92 = arith.constant 5 : index
    %207 = memref.load %arg16[%c1_91, %c5_92] : memref<2x7xf32, #tpu.memory_space<smem>>
    %208 = vector.extract_strided_slice %197 {offsets = [1, 0], sizes = [1, 128], strides = [1, 1]} : vector<2x128xf32> to vector<1x128xf32>
    %209 = vector.broadcast %207 : f32 to vector<1x128xf32>
    %210 = arith.mulf %209, %208 : vector<1x128xf32>
    %211 = arith.addf %206, %210 : vector<1x128xf32>
    %cst_93 = arith.constant 0.000000e+00 : f32
    %212 = vector.broadcast %cst_93 : f32 to vector<1x128xf32>
    %213 = arith.select %202, %211, %212 : vector<1x128xi1>, vector<1x128xf32>
    %214 = arith.addf %196, %213 : vector<1x128xf32>
    %c125_i32 = arith.constant 125 : i32
    %215 = tpu.dynamic_rotate %103 by %c125_i32 dim 1 : vector<2x128xf32>, i32 -> vector<2x128xf32>
    %c-3_i32 = arith.constant -3 : i32
    %216 = vector.broadcast %c-3_i32 : i32 to vector<1x128xi32>
    %217 = arith.cmpi sge, %2, %216 : vector<1x128xi32>
    %c125_i32_94 = arith.constant 125 : i32
    %218 = vector.broadcast %c125_i32_94 : i32 to vector<1x128xi32>
    %219 = arith.cmpi slt, %2, %218 : vector<1x128xi32>
    %220 = arith.andi %217, %219 : vector<1x128xi1>
    %c0_95 = arith.constant 0 : index
    %c6 = arith.constant 6 : index
    %221 = memref.load %arg16[%c0_95, %c6] : memref<2x7xf32, #tpu.memory_space<smem>>
    %222 = vector.extract_strided_slice %215 {offsets = [0, 0], sizes = [1, 128], strides = [1, 1]} : vector<2x128xf32> to vector<1x128xf32>
    %223 = vector.broadcast %221 : f32 to vector<1x128xf32>
    %224 = arith.mulf %223, %222 : vector<1x128xf32>
    %c1_96 = arith.constant 1 : index
    %c6_97 = arith.constant 6 : index
    %225 = memref.load %arg16[%c1_96, %c6_97] : memref<2x7xf32, #tpu.memory_space<smem>>
    %226 = vector.extract_strided_slice %215 {offsets = [1, 0], sizes = [1, 128], strides = [1, 1]} : vector<2x128xf32> to vector<1x128xf32>
    %227 = vector.broadcast %225 : f32 to vector<1x128xf32>
    %228 = arith.mulf %227, %226 : vector<1x128xf32>
    %229 = arith.addf %224, %228 : vector<1x128xf32>
    %cst_98 = arith.constant 0.000000e+00 : f32
    %230 = vector.broadcast %cst_98 : f32 to vector<1x128xf32>
    %231 = arith.select %220, %229, %230 : vector<1x128xi1>, vector<1x128xf32>
    %232 = arith.addf %214, %231 : vector<1x128xf32>
    %233 = arith.negf %232 : vector<1x128xf32>
    %234 = math.exp %233 : vector<1x128xf32>
    %cst_99 = arith.constant 1.000000e+00 : f32
    %235 = vector.broadcast %cst_99 : f32 to vector<1x128xf32>
    %236 = arith.addf %235, %234 : vector<1x128xf32>
    %237 = arith.divf %235, %236 : vector<1x128xf32>
    %238 = vector.broadcast %237 : vector<1x128xf32> to vector<32x128xf32>
    %239 = arith.mulf %238, %96 : vector<32x128xf32>
    %c0_100 = arith.constant 0 : index
    %c0_101 = arith.constant 0 : index
    %c0_102 = arith.constant 0 : index
    %240 = vector.load %arg18[%c0_100, %c0_101, %c0_102] : memref<1x32x128xf32, #tpu.memory_space<vmem>>, vector<1x32x128xf32>
    %241 = vector.shape_cast %240 : vector<1x32x128xf32> to vector<32x128xf32>
    %242 = vector.shape_cast %239 : vector<32x128xf32> to vector<1x32x128xf32>
    tpu.vector_store %arg18[%c0_100, %c0_101, %c0_102], %242 {strides = array<i32>} : memref<1x32x128xf32, #tpu.memory_space<vmem>>, vector<1x32x128xf32>,
    return
  }
  func.func @transform_0(%arg0: i32) -> (i32, i32, i32) {
    %c0_i32 = arith.constant 0 : i32
    %c0_i32_0 = arith.constant 0 : i32
    %c0_i32_1 = arith.constant 0 : i32
    return %arg0, %c0_i32, %c0_i32_0 : i32, i32, i32
  }
  func.func @transform_1(%arg0: i32) -> (i32, i32) {
    %c0_i32 = arith.constant 0 : i32
    %c0_i32_0 = arith.constant 0 : i32
    %c0_i32_1 = arith.constant 0 : i32
    return %c0_i32, %c0_i32_0 : i32, i32
  }
  func.func @transform_2(%arg0: i32) -> (i32, i32) {
    %c0_i32 = arith.constant 0 : i32
    %c0_i32_0 = arith.constant 0 : i32
    %c0_i32_1 = arith.constant 0 : i32
    return %c0_i32, %c0_i32_0 : i32, i32
  }
  func.func @transform_3(%arg0: i32) -> (i32, i32) {
    %c0_i32 = arith.constant 0 : i32
    %c0_i32_0 = arith.constant 0 : i32
    %c0_i32_1 = arith.constant 0 : i32
    return %c0_i32, %c0_i32_0 : i32, i32
  }
  func.func @transform_4(%arg0: i32) -> (i32, i32) {
    %c0_i32 = arith.constant 0 : i32
    %c0_i32_0 = arith.constant 0 : i32
    %c0_i32_1 = arith.constant 0 : i32
    return %c0_i32, %c0_i32_0 : i32, i32
  }
  func.func @transform_5(%arg0: i32) -> (i32, i32) {
    %c0_i32 = arith.constant 0 : i32
    %c0_i32_0 = arith.constant 0 : i32
    %c0_i32_1 = arith.constant 0 : i32
    return %c0_i32, %c0_i32_0 : i32, i32
  }
  func.func @transform_6(%arg0: i32) -> (i32, i32) {
    %c0_i32 = arith.constant 0 : i32
    %c0_i32_0 = arith.constant 0 : i32
    %c0_i32_1 = arith.constant 0 : i32
    return %c0_i32, %c0_i32_0 : i32, i32
  }
  func.func @transform_7(%arg0: i32) -> (i32, i32) {
    %c0_i32 = arith.constant 0 : i32
    %c0_i32_0 = arith.constant 0 : i32
    %c0_i32_1 = arith.constant 0 : i32
    return %c0_i32, %c0_i32_0 : i32, i32
  }
  func.func @transform_8(%arg0: i32) -> (i32, i32) {
    %c0_i32 = arith.constant 0 : i32
    %c0_i32_0 = arith.constant 0 : i32
    %c0_i32_1 = arith.constant 0 : i32
    return %c0_i32, %c0_i32_0 : i32, i32
  }
  func.func @transform_9(%arg0: i32) -> (i32, i32) {
    %c0_i32 = arith.constant 0 : i32
    %c0_i32_0 = arith.constant 0 : i32
    %c0_i32_1 = arith.constant 0 : i32
    return %c0_i32, %c0_i32_0 : i32, i32
  }
  func.func @transform_10(%arg0: i32) -> (i32, i32) {
    %c0_i32 = arith.constant 0 : i32
    %c0_i32_0 = arith.constant 0 : i32
    %c0_i32_1 = arith.constant 0 : i32
    return %c0_i32, %c0_i32_0 : i32, i32
  }
  func.func @transform_11(%arg0: i32) -> (i32, i32) {
    %c0_i32 = arith.constant 0 : i32
    %c0_i32_0 = arith.constant 0 : i32
    %c0_i32_1 = arith.constant 0 : i32
    return %c0_i32, %c0_i32_0 : i32, i32
  }
  func.func @transform_12(%arg0: i32) -> (i32, i32) {
    %c0_i32 = arith.constant 0 : i32
    %c0_i32_0 = arith.constant 0 : i32
    %c0_i32_1 = arith.constant 0 : i32
    return %c0_i32, %c0_i32_0 : i32, i32
  }
  func.func @transform_13(%arg0: i32) -> (i32, i32) {
    %c0_i32 = arith.constant 0 : i32
    %c0_i32_0 = arith.constant 0 : i32
    %c0_i32_1 = arith.constant 0 : i32
    return %c0_i32, %c0_i32_0 : i32, i32
  }
  func.func @transform_14(%arg0: i32) -> (i32, i32) {
    %c0_i32 = arith.constant 0 : i32
    %c0_i32_0 = arith.constant 0 : i32
    %c0_i32_1 = arith.constant 0 : i32
    return %c0_i32, %c0_i32_0 : i32, i32
  }
  func.func @transform_15(%arg0: i32) -> (i32, i32) {
    %c0_i32 = arith.constant 0 : i32
    %c0_i32_0 = arith.constant 0 : i32
    %c0_i32_1 = arith.constant 0 : i32
    return %c0_i32, %c0_i32_0 : i32, i32
  }
  func.func @transform_16(%arg0: i32) -> (i32, i32) {
    %c0_i32 = arith.constant 0 : i32
    %c0_i32_0 = arith.constant 0 : i32
    %c0_i32_1 = arith.constant 0 : i32
    return %c0_i32, %c0_i32_0 : i32, i32
  }
  func.func @transform_17(%arg0: i32) -> (i32, i32, i32) {
    %c0_i32 = arith.constant 0 : i32
    %c0_i32_0 = arith.constant 0 : i32
    %c0_i32_1 = arith.constant 0 : i32
    return %arg0, %c0_i32, %c0_i32_0 : i32, i32, i32
  }
}

</mosaic_0001>

<bundles_post_ra>
// kernel: tpu_custom_call.1
= control target key start
LH: loop header
LB: loop body
LE: loop exit
PB: predicated region body
PF: predicated region fallthrough
CT: control target
= control target key end

     0   :  { %s6515_s0 = inlined_call_operand.vmem [shape: f32[2,16,128], index: 0, kind: input, shape index: {}]   ;;  %s6516_s1 = inlined_call_operand.vmem [shape: f32[16,32], index: 1, kind: input, shape index: {}]   ;;  %s6517_s2 = inlined_call_operand.vmem [shape: f32[16,1], index: 2, kind: input, shape index: {}]   ;;  %s6518_s3 = inlined_call_operand.vmem [shape: f32[16,32], index: 3, kind: input, shape index: {}]   ;;  %s6519_s4 = inlined_call_operand.vmem [shape: f32[16,1], index: 4, kind: input, shape index: {}]   ;;  %s6520_s5 = inlined_call_operand.vmem [shape: f32[16,16], index: 5, kind: input, shape index: {}]   ;;  %s6521_s6 = inlined_call_operand.vmem [shape: f32[16,1], index: 6, kind: input, shape index: {}]   ;;  %s6522_s7 = inlined_call_operand.vmem [shape: f32[16,32], index: 7, kind: input, shape index: {}]   ;;  %s6523_s8 = inlined_call_operand.vmem [shape: f32[16,1], index: 8, kind: input, shape index: {}]   ;;  %s6524_s9 = inlined_call_operand.vmem [shape: f32[16,32], index: 9, kind: input, shape index: {}]   ;;  %s6525_s10 = inlined_call_operand.vmem [shape: f32[16,1], index: 10, kind: input, shape index: {}]   ;;  %s6526_s11 = inlined_call_operand.vmem [shape: f32[2,32], index: 11, kind: input, shape index: {}]   ;;  %s6527_s12 = inlined_call_operand.vmem [shape: f32[2,1], index: 12, kind: input, shape index: {}]   ;;  %s6528_s13 = inlined_call_operand.vmem [shape: f32[32,2], index: 13, kind: input, shape index: {}]   ;;  %s6529_s14 = inlined_call_operand.vmem [shape: f32[32,1], index: 14, kind: input, shape index: {}]   ;;  %s6530_s15 = inlined_call_operand.vmem [shape: f32[2,7], index: 15, kind: input, shape index: {}]   ;;  %s6531_s16 = inlined_call_operand.<no memory space> [shape: f32[1,1], index: 16, kind: input, shape index: {}]   ;;  %s6532_s17 = inlined_call_operand.hbm [shape: f32[2,32,128], index: 17, kind: output, shape index: {}]  }
   0x1   :  { %6534 = sst [smem:[#allocation10_spill]] %s6515_s0 }
   0x2   :  { %6535 = sst [smem:[#allocation11_spill]] %s6516_s1 }
   0x3   :  { %6536 = sst [smem:[#allocation12_spill]] %s6517_s2 }
   0x4   :  { %6537 = sst [smem:[#allocation13_spill]] %s6518_s3 }
   0x5   :  { %6538 = sst [smem:[#allocation14_spill]] %s6519_s4 }
   0x6   :  { %6539 = sst [smem:[#allocation15_spill]] %s6530_s15 }
   0x7   :  { %22 = sst [smem:[#allocation2]] %s6531_s16 }
   0x8   :  { %23 = vsyncpa [#allocation5], 0 }
   0x9   :  { %24 = vsyncpa [#allocation4], 0 }
   0xa   :  { %26 = vsyncpa [#allocation4 + $0x1], 0  ;;  %s6040_s26 = smov 0   ;;  %s6042_s27 = smov 0  }
   0xb   :  { %s6044_s28 = smov 0   ;;  %s6046_s29 = smov 0  }
   0xc LB: > { %s6061_s16 = sadd.s32 4294967295, %s5931_s29   ;;  %s4737_s0 = sadd.s32 4294967294, %s5931_s29   ;;  %s5931_s29 = sphi %s6046_s29, %s6554_s29   ;;  %s5927_s28 = sphi %s6044_s28, %s6553_s28   ;;  %s5923_s27 = sphi %s6042_s27, %s6552_s27   ;;  %s5919_s26 = sphi %s6040_s26, %s6551_s26  }
   0xd   : > { %s6065_s30 = sadd.s32 1, %s5931_s29   ;;  %s401_s18 = sadd.s32 1, %s5927_s28 }
   0xe   : > { %s398_s19 = ssub.s32 %s5931_s29, %s6065_s30  ;;  %p411_p0 = scmp.ne.s32.totalorder %s5927_s28, %s5923_s27 }
   0xf   : > { %p399_p1 = scmp.eq.s32.totalorder %s398_s19, 0  ;;  %p412_p2 = scmp.eq.s32.totalorder %s6061_s16, 1 }
  0x10   : > { %p417_p3 = scmp.ne.s32.totalorder %s5923_s27, %s5919_s26  ;;  %p418_p4 = scmp.eq.s32.totalorder %s4737_s0, 1 }
  0x11   : > { %s6076_s1 = scalar_select %p399_p1, %s5927_s28, %s401_s18  }
  0x12   : > { %p6078_p5 = por %p412_p2, %p411_p0  ;;  %p6082_p6 = por %p418_p4, %p417_p3 }
  0x13   : > { %6540 = sst [smem:[#allocation9_spill]] %s6076_s1  ;;  %p4738_p7 = scmp.ge.s32.totalorder %s5931_s29, 1 }
  0x14   : > { %p425_p8 = scmp.lt.s32.totalorder %s5931_s29, 3  ;;  %p5780_p9 = scmp.eq.s32.totalorder %s6061_s16, 0 }
  0x15   : > { %s6544_s15 = sld [smem:[#allocation15_spill]] }
  0x16   : > { %p6089_p10 = pnand %p4738_p7, %p425_p8 }
  0x18   : > { %p5772_p11 = pneg %p6089_p10 }
  0x1a   : > { %p5773_p12 = pnand %p5780_p9, %p5772_p11 }
  0x1b   : > { %s480_s25 = sshll.u32 %s6544_s15, 4  ;;  %s481_s25 = int_to_ptr.vmem [resolvable:$true] %s480_s25 }
  0x1c   : > { %s5850_s0 = scalar_lea.vmem %s481_s25, 32  ;;  %p5852_p0 = pneg %p5773_p12 }
  0x1d   : > { %p5851_p13 = scmp.ne.s32.totalorder %s481_s25, %s5850_s0  ;;  %p5858_p3 = scmp.lt.s32.totalorder %s481_s25, %s481_s25 }
  0x1e   : > { %p5859_p4 = scmp.lt.s32.totalorder %s5850_s0, %s5850_s0 }
  0x1f   : > { %p5853_p1 = pnand %p5852_p0, %p5851_p13 }
  0x20   : > { %p5860_p7 = por %p5859_p4, %p5858_p3 }
  0x21   : > { %p5854_p2 = pneg %p5853_p1 }
  0x23   : > { %p5861_p8 = pnand %p5860_p7, %p5854_p2 }
  0x25   : > { %5864 = shalt.err (!%p5861_p8)
}
  0x26   : > { %s5933_s18 = smov [#allocation3]   ;;  %504 = sbr.rel (%p6089_p10) target bundleno = 2458 (0x99a), region = 88 }
  0x27   : > { %5775 = dma.vmem_to_smem (!%p5773_p12), %s481_s25, 32, %s5933_s18, [#allocation5]  }
  0x2d   : > { %5910 = dma.done.wait (%p5780_p9), [#allocation5], 32  }
  0x2e   : > { %5912 = vsyncadd (%p5780_p9), [#allocation5], 4294967264 }
  0x2f   : > { %510 = sfence }
  0x30   : > { %p557_p11 = scmp.lt.s32.totalorder %s6061_s16, 1  ;;  %s6545_s15 = sld [smem:[#allocation10_spill]]  ;;  %vm589_vm0 = vcmask 261120   ;;  %v5935_v24 = vmov 0   ;;  %v564_v26 = vlaneseq  ;;  %v1682_v53 = vld [vmem:[%s6520_s5] sm:$0xff]  ;;  %vm1696_vm2 = vcmask 130048  }
  0x31   : > { %s5934_s22 = smov 1   ;;  %s6547_s2 = sld [smem:[#allocation12_spill]]  ;;  %5828 = vset.pattern.permute.xlu1 %v5935_v24  ;;  %5829 = vset.pattern.permute.xlu0 %v5935_v24  ;;  %v1683_v54 = vld [vmem:[%s6520_s5 + $0x8] sm:$0xff]  ;;  %v1698_v55 = vsel %vm1696_vm2, %v1682_v53, 0  ;;  %vm4511_vm4 = vcmask 1040384   ;;  %vm5939_vm5 = vmmov 0  }
  0x32   : > { %s558_s19 = scalar_select %p557_p11, %s6061_s16, 1  ;;  %v6136_v27 = vand.u32 127, %v564_v26  ;;  %v1701_v56 = vsel %vm1696_vm2, %v1683_v54, 0  ;;  %v1770_v57 = vand.u32 4294901760, %v1698_v55  ;;  %vm3851_vm6 = vcmask 15360  }
  0x33   : > { %v1780_v58 = vand.u32 4294901760, %v1701_v56  ;;  %s6548_s3 = sld [smem:[#allocation13_spill]]  ;;  %s6549_s4 = sld [smem:[#allocation14_spill]]  ;;  %vm3864_vm7 = vcmask 1041408  }
  0x34   : > { %s4769_s23 = sshll.u32 %s558_s19, 4  ;;  %vm566_vm1 = vcmp.ge.s32.totalorder %v6136_v27, 1  ;;  %v1771_v62 = vsub.f32 %v1698_v55, %v1770_v57  ;;  %s5936_s24 = smov 2   ;;  %vm2209_vm3 = vcmp.ge.s32.totalorder %v6136_v27, 2  ;;  %vm4518_vm8 = vcmp.ge.s32.totalorder %v6136_v27, 3 }
  0x35   : > { %v1781_v63 = vsub.f32 %v1701_v56, %v1780_v58  ;;  %s5938_s18 = smov 3   ;;  %s5942_s19 = smov 127   ;;  %vm4583_vm9 = vcmp.lt.s32.totalorder %v6136_v27, 127  ;;  %vm4600_vm10 = vcmp.lt.s32.totalorder %v6136_v27, 126  ;;  %vm4617_vm11 = vcmp.lt.s32.totalorder %v6136_v27, 125 }
  0x36   : > { %s561_s1 = scalar_lea.vmem %s6545_s15, %s4769_s23  ;;  %s6546_s15 = sld [smem:[#allocation11_spill]] }
  0x37   : > { %v562_v0 = vld [vmem:[%s561_s1] sm:$0xff]  ;;  %v563_v1 = vld [vmem:[%s561_s1 + $0x8] sm:$0xff]  ;;  %s5941_s1 = smov 126   ;;  %s5943_s23 = smov 125  }
  0x38   : > { %567 = vrot.lane.b32.xlu0 %v562_v0, %s5934_s22  ;;  %v603_v2 = vand.u32 4294901760, %v562_v0  ;;  %v606_v3 = vand.u32 4294901760, %v563_v1  ;;  %v577_v23 = vld [vmem:[%s6547_s2] sm:$0xff]  ;;  %v578_v25 = vld [vmem:[%s6547_s2 + $0x8] sm:$0xff]  ;;  %s4753_s0 = sld [smem:[#allocation3 + $0x2]]  ;;  %s4756_s25 = sld [smem:[#allocation3 + $0x83]] }
  0x39   : > { %581 = vperm.xlu1 %5828, %v577_v23   ;;  %s4758_s2 = sld [smem:[#allocation3 + $0x84]] }
  0x3a   : > { %v701_v4 = vsub.f32 %v562_v0, %v603_v2  ;;  %v708_v5 = vsub.f32 %v563_v1, %v606_v3  ;;  %v6112_v6 = vpack.c.bf16 %v606_v3, %v603_v2  ;;  %v1132_v0 = vld [vmem:[%s6548_s3] sm:$0xff] }
  0x3c   : > { %v702_v7 = vand.u32 4294901760, %v701_v4  ;;  %v709_v8 = vand.u32 4294901760, %v708_v5  ;;  %569 = vrot.lane.b32.xlu0 %v563_v1, %s5934_s22  ;;  %v575_v11 = vld [vmem:[%s6546_s15] sm:$0xff]  ;;  %v6124_v17 = vpack.c.bf16 %v708_v5, %v701_v4  ;;  %v576_v28 = vld [vmem:[%s6546_s15 + $0x8] sm:$0xff]  ;;  %v1147_v1 = vsel %vm589_vm0, %v1132_v0, 0 }
  0x3d   : > { %v591_v14 = vsel %vm589_vm0, %v575_v11, 0  ;;  %586 = vperm.xlu1 %5828, %v578_v25   ;;  %v594_v31 = vsel %vm589_vm0, %v576_v28, 0  ;;  %v6176_v2 = vand.u32 4294901760, %v1147_v1  ;;  %v1684_v28 = vld [vmem:[%s6521_s6] sm:$0xff] }
  0x3e   : > { %v703_v9 = vsub.f32 %v701_v4, %v702_v7  ;;  %v710_v10 = vsub.f32 %v708_v5, %v709_v8  ;;  %v6119_v15 = vand.u32 4294901760, %v591_v14  ;;  %v6127_v19 = vpack.c.bf16 %v709_v8, %v702_v7 }
  0x3f   : > { %v675_v35 = vand.u32 4294901760, %v594_v31  ;;  %v6180_v4 = vsub.f32 %v1147_v1, %v6176_v2 }
  0x40   : > { %v704_v12 = vand.u32 4294901760, %v703_v9  ;;  %v711_v13 = vand.u32 4294901760, %v710_v10  ;;  %5018 = vmatprep.mubr.f32.mxu0 %v6119_v15  ;;  %v666_v18 = vsub.f32 %v591_v14, %v6119_v15  ;;  %v1772_v10 = vand.u32 4294901760, %v1771_v62 }
  0x41   : > { %v676_v39 = vsub.f32 %v594_v31, %v675_v35  ;;  %v1223_v7 = vand.u32 4294901760, %v6180_v4 }
  0x42   : > { %v6121_v16 = vpack.c.bf16 %v711_v13, %v704_v12  ;;  %v667_v20 = vand.u32 4294901760, %v666_v18  ;;  %v1782_v13 = vand.u32 4294901760, %v1781_v63 }
  0x43   : > { %v677_v42 = vand.u32 4294901760, %v676_v39  ;;  %v1224_v14 = vsub.f32 %v6180_v4, %v1223_v7 }
  0x44   : > { %v668_v21 = vsub.f32 %v666_v18, %v667_v20 }
  0x45   : > { %v678_v45 = vsub.f32 %v676_v39, %v677_v42 }
  0x46   : > { %v669_v22 = vand.u32 4294901760, %v668_v21 }
  0x47   : > { %v679_v49 = vand.u32 4294901760, %v678_v45 }
  0x48   : > { %5007 = vmatprep.mubr.f32.mxu1 %v669_v22  ;;  %v1135_v22 = vld [vmem:[%s6549_s4 + $0x8] sm:$0xff] }
  0xaa   : > { %v568_v29 = vpop.permute.xlu0 %567 }
  0xab   : > { %v573_v30 = vsel %vm566_vm1, %v568_v29, 0.0 }
  0xac   : > { %v597_v32 = vand.u32 4294901760, %v573_v30 }
  0xae   : > { %v687_v33 = vsub.f32 %v573_v30, %v597_v32  ;;  %v570_v34 = vpop.permute.xlu0 %569 }
  0xaf   : > { %v574_v36 = vsel %vm566_vm1, %v570_v34, 0.0 }
  0xb0   : > { %v600_v37 = vand.u32 4294901760, %v574_v36  ;;  %v688_v38 = vand.u32 4294901760, %v687_v33 }
  0xb2   : > { %v5419_v40 = vpack.c.bf16 %v600_v37, %v597_v32  ;;  %v694_v41 = vsub.f32 %v574_v36, %v600_v37  ;;  %v689_v43 = vsub.f32 %v687_v33, %v688_v38  ;;  %v6202_v37 = vsub.f32 %v1771_v62, %v1772_v10 }
  0xb4   : > { %5420 = vmatprep.subr.bf16.mxu1 %v5419_v40  ;;  %v695_v44 = vand.u32 4294901760, %v694_v41  ;;  %v690_v47 = vand.u32 4294901760, %v689_v43  ;;  %v5435_v51 = vpack.c.bf16 %v694_v41, %v687_v33 }
  0xb5   : > { %5422 = vmatpush3.bf16.msra.mxu1 %v5419_v40 }
  0xb6   : > { %v696_v46 = vsub.f32 %v694_v41, %v695_v44  ;;  %5424 = vmatprep.subr.bf16.mxu1 %v6112_v6  ;;  %v5451_v52 = vpack.c.bf16 %v695_v44, %v688_v38  ;;  %v6204_v38 = vsub.f32 %v1781_v63, %v1782_v13  ;;  %v1133_v41 = vld [vmem:[%s6548_s3 + $0x8] sm:$0xff] }
  0xb8   : > { %v697_v48 = vand.u32 4294901760, %v696_v46  ;;  %v582_v61 = vpop.permute.xlu1 %581 }
  0xb9   : > { %5426 = vmatpush3.bf16.msra.mxu1 %v6112_v6 }
  0xba   : > { %v5427_v50 = vpack.c.bf16 %v697_v48, %v690_v47 }
  0xbc   : > { %5428 = vmatprep.subr.bf16.mxu0 %v5427_v50  ;;  %5008 = vmatmul.mubr.f32.vlgmr.msra.gmra.mrb[0].mxu1 %v679_v49  ;;  %v587_v3 = vpop.permute.xlu1 %586 }
  0xbd   : > { %5430 = vmatpush3.bf16.msra.mxu0 %v5427_v50 }
  0xbe   : > { %5432 = vmatprep.subr.bf16.mxu0 %v6121_v16 }
  0xc1   : > { %5434 = vmatpush3.bf16.msra.mxu0 %v6121_v16 }
  0xc2   : > { %5436 = vmatprep.subr.bf16.mxu0 %v5435_v51 }
  0xc4   : > { %5019 = vmatmul.mubr.f32.vlgmr.msra.gmra.mrb[0].mxu0 %v675_v35 }
  0xc5   : > { %5438 = vmatpush3.bf16.msra.mxu0 %v5435_v51  ;;  %5029 = vmatprep.mubr.f32.mxu0 %v666_v18 }
  0xc6   : > { %5440 = vmatprep.subr.bf16.mxu0 %v6124_v17 }
  0xc9   : > { %5442 = vmatpush3.bf16.msra.mxu0 %v6124_v17 }
  0xca   : > { %5444 = vmatprep.subr.bf16.mxu0 %v5419_v40 }
  0xcc   : > { %5030 = vmatmul.mubr.f32.vlgmr.msra.gmra.mrb[0].mxu0 %v676_v39  ;;  %v1134_v39 = vld [vmem:[%s6549_s4] sm:$0xff] }
  0xcd   : > { %5446 = vmatpush3.bf16.msra.mxu0 %v5419_v40  ;;  %5040 = vmatprep.mubr.f32.mxu0 %v667_v20 }
  0xce   : > { %5448 = vmatprep.subr.bf16.mxu0 %v6112_v6 }
  0xd1   : > { %5450 = vmatpush3.bf16.msra.mxu0 %v6112_v6 }
  0xd2   : > { %5452 = vmatprep.subr.bf16.mxu0 %v5451_v52 }
  0xd4   : > { %5041 = vmatmul.mubr.f32.vlgmr.msra.gmra.mrb[0].mxu0 %v677_v42  ;;  %v1150_v42 = vsel %vm589_vm0, %v1133_v41, 0 }
  0xd5   : > { %5454 = vmatpush3.bf16.msra.mxu0 %v5451_v52  ;;  %5051 = vmatprep.mubr.f32.mxu0 %v6119_v15  ;;  %v1231_v43 = vand.u32 4294901760, %v1150_v42 }
  0xd6   : > { %5456 = vmatprep.subr.bf16.mxu0 %v6127_v19 }
  0xd7   : > { %v1232_v44 = vsub.f32 %v1150_v42, %v1231_v43 }
  0xd9   : > { %5458 = vmatpush3.bf16.msra.mxu0 %v6127_v19  ;;  %v1233_v51 = vand.u32 4294901760, %v1232_v44 }
  0xda   : > { %5460 = vmatprep.subr.bf16.mxu0 %v5419_v40 }
  0xdc   : > { %5052 = vmatmul.mubr.f32.vlgmr.msra.gmra.mrb[0].mxu0 %v675_v35 }
  0xdd   : > { %5462 = vmatpush3.bf16.msra.mxu0 %v5419_v40  ;;  %5062 = vmatprep.mubr.f32.mxu0 %v6119_v15  ;;  %v1685_v40 = vld [vmem:[%s6521_s6 + $0x8] sm:$0xff] }
  0xde   : > { %5464 = vmatprep.subr.bf16.mxu0 %v6112_v6 }
  0xe1   : > { %5466 = vmatpush3.bf16.msra.mxu0 %v6112_v6 }
  0xe2   : > { %5520 = vmatprep.subr.bf16.mxu0 %v6121_v16 }
  0xe4   : > { %5063 = vmatmul.mubr.f32.vlgmr.msra.gmra.mrb[0].mxu0 %v675_v35 }
  0xe5   : > { %5522 = vmatpush3.bf16.msra.mxu0 %v6121_v16  ;;  %5142 = vmatprep.mubr.f32.mxu0 %v1770_v57 }
  0xe6   : > { %5524 = vmatprep.subr.bf16.mxu0 %v6124_v17 }
  0xe8   : > { %5143 = vmatmul.mubr.f32.vlgmr.msra.gmra.mrb[2].mxu0 %v1780_v58 }
  0xe9   : > { %5526 = vmatpush3.bf16.msra.mxu0 %v6124_v17  ;;  %5149 = vmatprep.mubr.f32.mxu0 %v1771_v62  ;;  %v1225_v17 = vand.u32 4294901760, %v1224_v14 }
  0xea   : > { %5528 = vmatprep.subr.bf16.mxu0 %v6112_v6 }
  0xeb   : > { %5073 = vmatprep.mubr.f32.mxu1 %v1225_v17 }
  0xf0   : > { %5150 = vmatmul.mubr.f32.vlgmr.msra.gmra.mrb[2].mxu0 %v1781_v63 }
  0xf1   : > { %5530 = vmatpush3.bf16.msra.mxu0 %v6112_v6  ;;  %5156 = vmatprep.mubr.f32.mxu0 %v1772_v10 }
  0xf2   : > { %5532 = vmatprep.subr.bf16.mxu0 %v6127_v19 }
  0xf8   : > { %5157 = vmatmul.mubr.f32.vlgmr.msra.gmra.mrb[2].mxu0 %v1782_v13 }
  0xf9   : > { %5534 = vmatpush3.bf16.msra.mxu0 %v6127_v19  ;;  %5163 = vmatprep.mubr.f32.mxu0 %v1770_v57 }
  0xfa   : > { %5536 = vmatprep.subr.bf16.mxu0 %v6112_v6 }
 0x100   : > { %5164 = vmatmul.mubr.f32.vlgmr.msra.gmra.mrb[2].mxu0 %v1780_v58 }
 0x101   : > { %5538 = vmatpush3.bf16.msra.mxu0 %v6112_v6  ;;  %5170 = vmatprep.mubr.f32.mxu0 %v1770_v57  ;;  %v1234_v57 = vsub.f32 %v1232_v44, %v1233_v51 }
 0x108   : > { %5171 = vmatmul.mubr.f32.vlgmr.msra.gmra.mrb[2].mxu0 %v1780_v58 }
 0x18f   : > { %v5009_v59 = vpop.f32.mrb[0].mxu1 }
 0x190   : > { %v671_v60 = vpop.f32.mrb[1].mxu1  ;;  %v682_v5 = vadd.f32 %v5009_v59, %v587_v3  ;;  %v1774_v3 = vand.u32 4294901760, %v6202_v37  ;;  %v2219_v37 = vld [vmem:[%s6522_s7 + $0x8] sm:$0xff] }
 0x191   : > { %v672_v8 = vadd.f32 %v671_v60, %v582_v61  ;;  %v1235_v61 = vand.u32 4294901760, %v1234_v57 }
 0x1b7   : > { %v5064_v9 = vpop.f32.mrb[0].mxu0 }
 0x1b8   : > { %v5672_v11 = vadd.f32 %v5064_v9, %v682_v5  ;;  %v1114_v12 = vpop.f32.mrb[1].mxu0 }
 0x1b9   : > { %v5674_v15 = vadd.f32 %v1114_v12, %v672_v8 }
 0x1ba   : > { %v1125_v16 = vmax.f32 %v5672_v11, 0.0  ;;  %v2218_v11 = vld [vmem:[%s6522_s7] sm:$0xff] }
 0x1bb   : > { %v1124_v18 = vmax.f32 %v5674_v15, 0.0  ;;  %v2233_v12 = vsel %vm589_vm0, %v2218_v11, 0 }
 0x1bc   : > { %v1162_v20 = vand.u32 4294901760, %v1125_v16  ;;  %1128 = vrot.lane.b32.xlu1 %v1125_v16, %s5934_s22  ;;  %v6242_v14 = vand.u32 4294901760, %v2233_v12 }
 0x1bd   : > { %v1159_v21 = vand.u32 4294901760, %v1124_v18  ;;  %1126 = vrot.lane.b32.xlu0 %v1124_v18, %s5934_s22 }
 0x1be   : > { %v1264_v23 = vsub.f32 %v1125_v16, %v1162_v20 }
 0x1bf   : > { %v6194_v24 = vpack.c.bf16 %v1162_v20, %v1159_v21  ;;  %v1257_v25 = vsub.f32 %v1124_v18, %v1159_v21  ;;  %v6245_v21 = vsub.f32 %v2233_v12, %v6242_v14 }
 0x1c0   : > { %1143 = vperm.xlu1 %5828, %v1135_v22   ;;  %v1265_v19 = vand.u32 4294901760, %v1264_v23 }
 0x1c1   : > { %v1258_v29 = vand.u32 4294901760, %v1257_v25  ;;  %v5487_v30 = vpack.c.bf16 %v1264_v23, %v1257_v25  ;;  %1138 = vperm.xlu0 %5829, %v1134_v39  }
 0x1c2   : > { %v1266_v31 = vsub.f32 %v1264_v23, %v1265_v19 }
 0x1c3   : > { %v1259_v32 = vsub.f32 %v1257_v25, %v1258_v29  ;;  %v6200_v33 = vpack.c.bf16 %v1265_v19, %v1258_v29  ;;  %v2309_v25 = vand.u32 4294901760, %v6245_v21 }
 0x1c4   : > { %1688 = vperm.xlu1 %5828, %v1684_v28   ;;  %v1267_v34 = vand.u32 4294901760, %v1266_v31 }
 0x1c5   : > { %v1260_v35 = vand.u32 4294901760, %v1259_v32  ;;  %1693 = vperm.xlu0 %5829, %v1685_v40  }
 0x1c7   : > { %v5479_v36 = vpack.c.bf16 %v1267_v34, %v1260_v35  ;;  %v2221_v35 = vld [vmem:[%s6523_s8 + $0x8] sm:$0xff] }
 0x1db   : > { %v5172_v5 = vpop.f32.mrb[2].mxu0 }
 0x22e   : > { %v1129_v45 = vpop.permute.xlu1 %1128 }
 0x22f   : > { %v1131_v46 = vsel %vm566_vm1, %v1129_v45, 0.0  ;;  %v1127_v47 = vpop.permute.xlu0 %1126 }
 0x230   : > { %v1156_v48 = vand.u32 4294901760, %v1131_v46  ;;  %v1130_v49 = vsel %vm566_vm1, %v1127_v47, 0.0 }
 0x231   : > { %v1153_v50 = vand.u32 4294901760, %v1130_v49 }
 0x232   : > { %v1250_v52 = vsub.f32 %v1131_v46, %v1156_v48 }
 0x233   : > { %v5467_v53 = vpack.c.bf16 %v1156_v48, %v1153_v50  ;;  %v1243_v54 = vsub.f32 %v1130_v49, %v1153_v50 }
 0x234   : > { %v1251_v55 = vand.u32 4294901760, %v1250_v52 }
 0x235   : > { %v1244_v56 = vand.u32 4294901760, %v1243_v54  ;;  %5468 = vmatprep.subr.bf16.mxu1 %v5467_v53  ;;  %v5483_v0 = vpack.c.bf16 %v1250_v52, %v1243_v54 }
 0x236   : > { %v1252_v58 = vsub.f32 %v1250_v52, %v1251_v55  ;;  %5470 = vmatpush3.bf16.msra.mxu1 %v5467_v53 }
 0x237   : > { %v1245_v59 = vsub.f32 %v1243_v54, %v1244_v56  ;;  %5472 = vmatprep.subr.bf16.mxu1 %v6194_v24  ;;  %v5499_v1 = vpack.c.bf16 %v1251_v55, %v1244_v56 }
 0x238   : > { %v1253_v60 = vand.u32 4294901760, %v1252_v58 }
 0x239   : > { %v1246_v62 = vand.u32 4294901760, %v1245_v59 }
 0x23a   : > { %5474 = vmatpush3.bf16.msra.mxu1 %v6194_v24 }
 0x23b   : > { %v5475_v63 = vpack.c.bf16 %v1253_v60, %v1246_v62 }
 0x23d   : > { %5074 = vmatmul.mubr.f32.vlgmr.msra.gmra.mrb[2].mxu1 %v1235_v61  ;;  %5476 = vmatprep.subr.bf16.mxu1 %v5475_v63 }
 0x23e   : > { %5478 = vmatpush3.bf16.msra.mxu1 %v5475_v63  ;;  %5084 = vmatprep.mubr.f32.mxu1 %v6176_v2 }
 0x23f   : > { %5480 = vmatprep.subr.bf16.mxu1 %v5479_v36  ;;  %v1144_v9 = vpop.permute.xlu1 %1143 }
 0x240   : > { %v1139_v8 = vpop.permute.xlu0 %1138 }
 0x242   : > { %5482 = vmatpush3.bf16.msra.mxu1 %v5479_v36  ;;  %v2220_v36 = vld [vmem:[%s6523_s8] sm:$0xff] }
 0x243   : > { %5484 = vmatprep.subr.bf16.mxu1 %v5483_v0  ;;  %v1689_v17 = vpop.permute.xlu1 %1688 }
 0x244   : > { %v1694_v15 = vpop.permute.xlu0 %1693 }
 0x245   : > { %5085 = vmatmul.mubr.f32.vlgmr.msra.gmra.mrb[2].mxu1 %v1231_v43 }
 0x246   : > { %5486 = vmatpush3.bf16.msra.mxu1 %v5483_v0  ;;  %5095 = vmatprep.mubr.f32.mxu1 %v6180_v4  ;;  %v1784_v4 = vand.u32 4294901760, %v6204_v38  ;;  %v2236_v38 = vsel %vm589_vm0, %v2219_v37, 0 }
 0x247   : > { %5488 = vmatprep.subr.bf16.mxu1 %v5487_v30  ;;  %v6269_v39 = vand.u32 4294901760, %v2236_v38 }
 0x249   : > { %v2318_v42 = vsub.f32 %v2236_v38, %v6269_v39 }
 0x24a   : > { %5490 = vmatpush3.bf16.msra.mxu1 %v5487_v30  ;;  %v2310_v30 = vsub.f32 %v6245_v21, %v2309_v25 }
 0x24b   : > { %5492 = vmatprep.subr.bf16.mxu1 %v5467_v53  ;;  %v2319_v50 = vand.u32 4294901760, %v2318_v42 }
 0x24d   : > { %5096 = vmatmul.mubr.f32.vlgmr.msra.gmra.mrb[2].mxu1 %v1232_v44  ;;  %v2320_v58 = vsub.f32 %v2318_v42, %v2319_v50 }
 0x24e   : > { %5494 = vmatpush3.bf16.msra.mxu1 %v5467_v53  ;;  %5106 = vmatprep.mubr.f32.mxu1 %v1223_v7  ;;  %v2195_v7 = vpop.f32.mrb[3].mxu0 }
 0x24f   : > { %5496 = vmatprep.subr.bf16.mxu1 %v6194_v24 }
 0x252   : > { %5498 = vmatpush3.bf16.msra.mxu1 %v6194_v24 }
 0x253   : > { %5500 = vmatprep.subr.bf16.mxu1 %v5499_v1 }
 0x255   : > { %5107 = vmatmul.mubr.f32.vlgmr.msra.gmra.mrb[2].mxu1 %v1233_v51 }
 0x256   : > { %5502 = vmatpush3.bf16.msra.mxu1 %v5499_v1  ;;  %5117 = vmatprep.mubr.f32.mxu1 %v6176_v2 }
 0x257   : > { %5504 = vmatprep.subr.bf16.mxu1 %v6200_v33 }
 0x25a   : > { %5506 = vmatpush3.bf16.msra.mxu1 %v6200_v33  ;;  %v2311_v33 = vand.u32 4294901760, %v2310_v30 }
 0x25b   : > { %5508 = vmatprep.subr.bf16.mxu1 %v5467_v53 }
 0x25d   : > { %5118 = vmatmul.mubr.f32.vlgmr.msra.gmra.mrb[2].mxu1 %v1231_v43 }
 0x25e   : > { %5510 = vmatpush3.bf16.msra.mxu1 %v5467_v53  ;;  %5128 = vmatprep.mubr.f32.mxu1 %v6176_v2 }
 0x25f   : > { %5512 = vmatprep.subr.bf16.mxu1 %v6194_v24 }
 0x262   : > { %5514 = vmatpush3.bf16.msra.mxu1 %v6194_v24 }
 0x263   : > { %5516 = vmatprep.subr.bf16.mxu1 %v6112_v6 }
 0x265   : > { %5129 = vmatmul.mubr.f32.vlgmr.msra.gmra.mrb[2].mxu1 %v1231_v43 }
 0x266   : > { %5518 = vmatpush3.bf16.msra.mxu1 %v6112_v6  ;;  %5135 = vmatprep.mubr.f32.mxu1 %v1774_v3  ;;  %v2321_v3 = vand.u32 4294901760, %v2320_v58 }
 0x269   : > { %5136 = vmatmul.mubr.f32.vlgmr.msra.gmra.mrb[4].mxu1 %v1784_v4 }
 0x26a   : > { %5181 = vmatprep.mubr.f32.mxu1 %v2311_v33 }
 0x338   : > { %v5130_v2 = vpop.f32.mrb[2].mxu1 }
 0x339   : > { %v1670_v10 = vpop.f32.mrb[3].mxu1  ;;  %v5675_v13 = vadd.f32 %v5130_v2, %v1144_v9 }
 0x33a   : > { %v5676_v16 = vadd.f32 %v1670_v10, %v1139_v8 }
 0x33b   : > { %v1681_v23 = vmax.f32 %v5675_v13, 0.0  ;;  %v2774_v13 = vld [vmem:[%s6524_s9] sm:$0xff] }
 0x33c   : > { %v5137_v6 = vpop.f32.mrb[4].mxu1  ;;  %v1680_v19 = vmax.f32 %v5676_v16, 0.0 }
 0x33d   : > { %v1787_v18 = vadd.f32 %v5137_v6, %v1694_v15  ;;  %v1776_v20 = vpop.f32.mrb[5].mxu1  ;;  %v2789_v15 = vsel %vm589_vm0, %v2774_v13, 0 }
 0x33e   : > { %v1777_v22 = vadd.f32 %v1776_v20, %v1689_v17  ;;  %v6294_v16 = vand.u32 4294901760, %v2789_v15 }
 0x33f   : > { %v5678_v24 = vadd.f32 %v5172_v5, %v1787_v18 }
 0x340   : > { %v5680_v28 = vadd.f32 %v2195_v7, %v1777_v22  ;;  %v6297_v6 = vsub.f32 %v2789_v15, %v6294_v16 }
 0x341   : > { %v2206_v29 = vadd.f32 %v5678_v24, %v1681_v23 }
 0x342   : > { %v2205_v31 = vadd.f32 %v5680_v28, %v1680_v19  ;;  %v2865_v17 = vand.u32 4294901760, %v6297_v6 }
 0x343   : > { %v6251_v32 = vmax.f32 %v2206_v29, 0.0 }
 0x344   : > { %v6253_v34 = vmax.f32 %v2205_v31, 0.0  ;;  %v2866_v23 = vsub.f32 %v6297_v6, %v2865_v17  ;;  %v2777_v31 = vld [vmem:[%s6525_s10 + $0x8] sm:$0xff] }
 0x345   : > { %2212 = vrot.lane.b32.xlu0 %v6251_v32, %s5936_s24  ;;  %v2248_v41 = vand.u32 4294901760, %v6251_v32 }
 0x346   : > { %2210 = vrot.lane.b32.xlu1 %v6253_v34, %s5936_s24  ;;  %v2245_v40 = vand.u32 4294901760, %v6253_v34  ;;  %v2867_v19 = vand.u32 4294901760, %v2866_v23 }
 0x347   : > { %v2350_v44 = vsub.f32 %v6251_v32, %v2248_v41 }
 0x348   : > { %v2343_v43 = vsub.f32 %v6253_v34, %v2245_v40  ;;  %v5543_v60 = vpack.c.bf16 %v2248_v41, %v2245_v40  ;;  %5247 = vmatprep.mubr.f32.mxu0 %v2867_v19 }
 0x349   : > { %2229 = vperm.xlu0 %5829, %v2221_v35   ;;  %v2351_v53 = vand.u32 4294901760, %v2350_v44  ;;  %v2776_v35 = vld [vmem:[%s6525_s10] sm:$0xff] }
 0x34a   : > { %2224 = vperm.xlu1 %5828, %v2220_v36   ;;  %v2344_v52 = vand.u32 4294901760, %v2343_v43  ;;  %v5559_v10 = vpack.c.bf16 %v2350_v44, %v2343_v43 }
 0x34b   : > { %v2352_v62 = vsub.f32 %v2350_v44, %v2351_v53 }
 0x34c   : > { %v2345_v61 = vsub.f32 %v2343_v43, %v2344_v52  ;;  %v5575_v12 = vpack.c.bf16 %v2351_v53, %v2344_v52 }
 0x34d   : > { %v2353_v7 = vand.u32 4294901760, %v2352_v62 }
 0x34e   : > { %v2346_v5 = vand.u32 4294901760, %v2345_v61 }
 0x350   : > { %v5551_v9 = vpack.c.bf16 %v2353_v7, %v2346_v5 }
 0x3b7   : > { %v2213_v45 = vpop.permute.xlu0 %2212 }
 0x3b8   : > { %v2217_v46 = vsel %vm2209_vm3, %v2213_v45, 0.0  ;;  %v2211_v47 = vpop.permute.xlu1 %2210 }
 0x3b9   : > { %v2242_v48 = vand.u32 4294901760, %v2217_v46  ;;  %v2216_v49 = vsel %vm2209_vm3, %v2211_v47, 0.0  ;;  %v5937_v47 = vmov 0.0|0.0  }
 0x3ba   : > { %v2239_v51 = vand.u32 4294901760, %v2216_v49 }
 0x3bb   : > { %v2336_v54 = vsub.f32 %v2217_v46, %v2242_v48 }
 0x3bc   : > { %v5539_v55 = vpack.c.bf16 %v2242_v48, %v2239_v51  ;;  %v2329_v56 = vsub.f32 %v2216_v49, %v2239_v51  ;;  %v2775_v48 = vld [vmem:[%s6524_s9 + $0x8] sm:$0xff] }
 0x3bd   : > { %v2337_v57 = vand.u32 4294901760, %v2336_v54  ;;  %v2792_v49 = vsel %vm589_vm0, %v2775_v48, 0  ;;  %v4491_v48 = vadd.f32 %v6251_v32, %v6253_v34 }
 0x3be   : > { %v2330_v59 = vand.u32 4294901760, %v2329_v56  ;;  %5540 = vmatprep.subr.bf16.mxu1 %v5539_v55  ;;  %v5555_v2 = vpack.c.bf16 %v2336_v54, %v2329_v56 }
 0x3bf   : > { %v2338_v63 = vsub.f32 %v2336_v54, %v2337_v57  ;;  %5542 = vmatpush3.bf16.msra.mxu1 %v5539_v55 }
 0x3c0   : > { %v2331_v0 = vsub.f32 %v2329_v56, %v2330_v59  ;;  %5544 = vmatprep.subr.bf16.mxu1 %v5543_v60  ;;  %v5571_v11 = vpack.c.bf16 %v2337_v57, %v2330_v59 }
 0x3c1   : > { %v2339_v1 = vand.u32 4294901760, %v2338_v63 }
 0x3c2   : > { %v2332_v4 = vand.u32 4294901760, %v2331_v0 }
 0x3c3   : > { %5546 = vmatpush3.bf16.msra.mxu1 %v5543_v60 }
 0x3c4   : > { %v5547_v8 = vpack.c.bf16 %v2339_v1, %v2332_v4 }
 0x3c6   : > { %5182 = vmatmul.mubr.f32.vlgmr.msra.gmra.mrb[6].mxu1 %v2321_v3  ;;  %5548 = vmatprep.subr.bf16.mxu1 %v5547_v8 }
 0x3c7   : > { %5550 = vmatpush3.bf16.msra.mxu1 %v5547_v8  ;;  %5192 = vmatprep.mubr.f32.mxu1 %v6242_v14 }
 0x3c8   : > { %5552 = vmatprep.subr.bf16.mxu1 %v5551_v9  ;;  %v2230_v18 = vpop.permute.xlu0 %2229 }
 0x3cb   : > { %5554 = vmatpush3.bf16.msra.mxu1 %v5551_v9 }
 0x3cc   : > { %5556 = vmatprep.subr.bf16.mxu1 %v5555_v2 }
 0x3ce   : > { %5193 = vmatmul.mubr.f32.vlgmr.msra.gmra.mrb[6].mxu1 %v6269_v39 }
 0x3cf   : > { %5558 = vmatpush3.bf16.msra.mxu1 %v5555_v2  ;;  %5203 = vmatprep.mubr.f32.mxu1 %v6245_v21 }
 0x3d0   : > { %5560 = vmatprep.subr.bf16.mxu1 %v5559_v10 }
 0x3d3   : > { %5562 = vmatpush3.bf16.msra.mxu1 %v5559_v10 }
 0x3d4   : > { %5564 = vmatprep.subr.bf16.mxu1 %v5539_v55 }
 0x3d6   : > { %5204 = vmatmul.mubr.f32.vlgmr.msra.gmra.mrb[6].mxu1 %v2318_v42 }
 0x3d7   : > { %5566 = vmatpush3.bf16.msra.mxu1 %v5539_v55  ;;  %5214 = vmatprep.mubr.f32.mxu1 %v2309_v25 }
 0x3d8   : > { %5568 = vmatprep.subr.bf16.mxu1 %v5543_v60 }
 0x3db   : > { %5570 = vmatpush3.bf16.msra.mxu1 %v5543_v60 }
 0x3dc   : > { %5572 = vmatprep.subr.bf16.mxu1 %v5571_v11 }
 0x3de   : > { %5215 = vmatmul.mubr.f32.vlgmr.msra.gmra.mrb[6].mxu1 %v2319_v50  ;;  %v2873_v50 = vand.u32 4294901760, %v2792_v49 }
 0x3df   : > { %5574 = vmatpush3.bf16.msra.mxu1 %v5571_v11  ;;  %5225 = vmatprep.mubr.f32.mxu1 %v6242_v14 }
 0x3e0   : > { %5576 = vmatprep.subr.bf16.mxu1 %v5575_v12  ;;  %v2874_v51 = vsub.f32 %v2792_v49, %v2873_v50 }
 0x3e2   : > { %v2875_v58 = vand.u32 4294901760, %v2874_v51 }
 0x3e3   : > { %5578 = vmatpush3.bf16.msra.mxu1 %v5575_v12 }
 0x3e4   : > { %5580 = vmatprep.subr.bf16.mxu1 %v5539_v55  ;;  %v2876_v0 = vsub.f32 %v2874_v51, %v2875_v58 }
 0x3e6   : > { %5226 = vmatmul.mubr.f32.vlgmr.msra.gmra.mrb[6].mxu1 %v6269_v39  ;;  %v2877_v5 = vand.u32 4294901760, %v2876_v0 }
 0x3e7   : > { %5582 = vmatpush3.bf16.msra.mxu1 %v5539_v55  ;;  %5236 = vmatprep.mubr.f32.mxu1 %v6242_v14  ;;  %v2225_v14 = vpop.permute.xlu1 %2224 }
 0x3e8   : > { %5584 = vmatprep.subr.bf16.mxu1 %v5543_v60 }
 0x3eb   : > { %5586 = vmatpush3.bf16.msra.mxu1 %v5543_v60 }
 0x3ec   : > { %5635 = vmatprep.subr.bf16.mxu1 %v5937_v47 }
 0x3ee   : > { %5237 = vmatmul.mubr.f32.vlgmr.msra.gmra.mrb[6].mxu1 %v6269_v39 }
 0x4c1   : > { %v5238_v20 = vpop.f32.mrb[6].mxu1 }
 0x4c2   : > { %v5681_v21 = vadd.f32 %v5238_v20, %v2230_v18  ;;  %v2756_v22 = vpop.f32.mrb[7].mxu1 }
 0x4c3   : > { %v5682_v24 = vadd.f32 %v2756_v22, %v2225_v14 }
 0x4c4   : > { %v2767_v25 = vmax.f32 %v5681_v21, 0.0 }
 0x4c5   : > { %v2766_v28 = vmax.f32 %v5682_v24, 0.0 }
 0x4c6   : > { %v2804_v29 = vand.u32 4294901760, %v2767_v25  ;;  %2770 = vrot.lane.b32.xlu0 %v2767_v25, %s5936_s24 }
 0x4c7   : > { %v2801_v30 = vand.u32 4294901760, %v2766_v28  ;;  %2768 = vrot.lane.b32.xlu1 %v2766_v28, %s5936_s24 }
 0x4c8   : > { %v2906_v33 = vsub.f32 %v2767_v25, %v2804_v29 }
 0x4c9   : > { %v6311_v36 = vpack.c.bf16 %v2804_v29, %v2801_v30  ;;  %v2899_v37 = vsub.f32 %v2766_v28, %v2801_v30 }
 0x4ca   : > { %2785 = vperm.xlu0 %5829, %v2777_v31   ;;  %v2907_v38 = vand.u32 4294901760, %v2906_v33 }
 0x4cb   : > { %2780 = vperm.xlu1 %5828, %v2776_v35   ;;  %v2900_v39 = vand.u32 4294901760, %v2899_v37  ;;  %v5607_v40 = vpack.c.bf16 %v2906_v33, %v2899_v37 }
 0x4cc   : > { %v2908_v41 = vsub.f32 %v2906_v33, %v2907_v38 }
 0x4cd   : > { %v2901_v42 = vsub.f32 %v2899_v37, %v2900_v39  ;;  %v5623_v43 = vpack.c.bf16 %v2907_v38, %v2900_v39 }
 0x4ce   : > { %v2909_v44 = vand.u32 4294901760, %v2908_v41 }
 0x4cf   : > { %v2902_v45 = vand.u32 4294901760, %v2901_v42 }
 0x4d1   : > { %v5599_v46 = vpack.c.bf16 %v2909_v44, %v2902_v45 }
 0x4e9   : > { %3330 = vadd.xlane.f32.xlu0 %v6251_v32 }
 0x4ed   : > { %3341 = vmax.xlane.f32.xlu0 %v6253_v34 }
 0x4ef   : > { %3328 = vadd.xlane.f32.xlu1 %v6253_v34 }
 0x4f3   : > { %3343 = vmax.xlane.f32.xlu1 %v6251_v32 }
 0x538   : > { %v2771_v52 = vpop.permute.xlu0 %2770 }
 0x539   : > { %v2773_v53 = vsel %vm2209_vm3, %v2771_v52, 0.0  ;;  %v2769_v54 = vpop.permute.xlu1 %2768 }
 0x53a   : > { %v2798_v55 = vand.u32 4294901760, %v2773_v53  ;;  %v2772_v56 = vsel %vm2209_vm3, %v2769_v54, 0.0 }
 0x53b   : > { %v2795_v57 = vand.u32 4294901760, %v2772_v56 }
 0x53c   : > { %v2892_v59 = vsub.f32 %v2773_v53, %v2798_v55 }
 0x53d   : > { %v5587_v60 = vpack.c.bf16 %v2798_v55, %v2795_v57  ;;  %v2885_v61 = vsub.f32 %v2772_v56, %v2795_v57 }
 0x53e   : > { %v2893_v62 = vand.u32 4294901760, %v2892_v59 }
 0x53f   : > { %v2886_v63 = vand.u32 4294901760, %v2885_v61  ;;  %5588 = vmatprep.subr.bf16.mxu0 %v5587_v60  ;;  %v5603_v9 = vpack.c.bf16 %v2892_v59, %v2885_v61 }
 0x540   : > { %v2894_v1 = vsub.f32 %v2892_v59, %v2893_v62  ;;  %5590 = vmatpush3.bf16.msra.mxu0 %v5587_v60 }
 0x541   : > { %v2887_v3 = vsub.f32 %v2885_v61, %v2886_v63  ;;  %5592 = vmatprep.subr.bf16.mxu0 %v6311_v36  ;;  %v5619_v2 = vpack.c.bf16 %v2893_v62, %v2886_v63 }
 0x542   : > { %v2895_v4 = vand.u32 4294901760, %v2894_v1 }
 0x543   : > { %v2888_v7 = vand.u32 4294901760, %v2887_v3 }
 0x544   : > { %5594 = vmatpush3.bf16.msra.mxu0 %v6311_v36 }
 0x545   : > { %v5595_v8 = vpack.c.bf16 %v2895_v4, %v2888_v7  ;;  %v3353_v7 = vld [vmem:[%s6526_s11] sm:$0x3] }
 0x547   : > { %5248 = vmatmul.mubr.f32.vlgmr.msra.gmra.mrb[4].mxu0 %v2877_v5  ;;  %5596 = vmatprep.subr.bf16.mxu0 %v5595_v8  ;;  %v5940_v5 = vmov 0.0  }
 0x548   : > { %5598 = vmatpush3.bf16.msra.mxu0 %v5595_v8  ;;  %5258 = vmatprep.mubr.f32.mxu0 %v6294_v16  ;;  %v3356_v8 = vsel %vm589_vm0, %v3353_v7, 0 }
 0x549   : > { %5600 = vmatprep.subr.bf16.mxu0 %v5599_v46  ;;  %v2786_v10 = vpop.permute.xlu0 %2785  ;;  %5313 = vmatprep.mubr.msk.f32.mxu1 %vm5939_vm5, %v5940_v5 }
 0x54a   : > { %v2781_v11 = vpop.permute.xlu1 %2780 }
 0x54c   : > { %5602 = vmatpush3.bf16.msra.mxu0 %v5599_v46 }
 0x54d   : > { %5604 = vmatprep.subr.bf16.mxu0 %v5603_v9 }
 0x54f   : > { %5259 = vmatmul.mubr.f32.vlgmr.msra.gmra.mrb[4].mxu0 %v2873_v50 }
 0x550   : > { %5606 = vmatpush3.bf16.msra.mxu0 %v5603_v9  ;;  %5269 = vmatprep.mubr.f32.mxu0 %v6297_v6  ;;  %v3427_v9 = vand.u32 4294901760, %v3356_v8 }
 0x551   : > { %5608 = vmatprep.subr.bf16.mxu0 %v5607_v40 }
 0x554   : > { %5610 = vmatpush3.bf16.msra.mxu0 %v5607_v40 }
 0x555   : > { %5612 = vmatprep.subr.bf16.mxu0 %v5587_v60 }
 0x557   : > { %5270 = vmatmul.mubr.f32.vlgmr.msra.gmra.mrb[4].mxu0 %v2874_v51 }
 0x558   : > { %5614 = vmatpush3.bf16.msra.mxu0 %v5587_v60  ;;  %5280 = vmatprep.mubr.f32.mxu0 %v2865_v17 }
 0x559   : > { %5616 = vmatprep.subr.bf16.mxu0 %v6311_v36 }
 0x55c   : > { %5618 = vmatpush3.bf16.msra.mxu0 %v6311_v36 }
 0x55d   : > { %5620 = vmatprep.subr.bf16.mxu0 %v5619_v2 }
 0x55f   : > { %5281 = vmatmul.mubr.f32.vlgmr.msra.gmra.mrb[4].mxu0 %v2875_v58 }
 0x560   : > { %5622 = vmatpush3.bf16.msra.mxu0 %v5619_v2  ;;  %5291 = vmatprep.mubr.f32.mxu0 %v6294_v16  ;;  %v3428_v2 = vsub.f32 %v3356_v8, %v3427_v9 }
 0x561   : > { %5624 = vmatprep.subr.bf16.mxu0 %v5623_v43 }
 0x564   : > { %5626 = vmatpush3.bf16.msra.mxu0 %v5623_v43 }
 0x565   : > { %5628 = vmatprep.subr.bf16.mxu0 %v5587_v60 }
 0x567   : > { %5292 = vmatmul.mubr.f32.vlgmr.msra.gmra.mrb[4].mxu0 %v2873_v50 }
 0x568   : > { %5630 = vmatpush3.bf16.msra.mxu0 %v5587_v60  ;;  %5302 = vmatprep.mubr.f32.mxu0 %v6294_v16 }
 0x569   : > { %5632 = vmatprep.subr.bf16.mxu0 %v6311_v36 }
 0x56c   : > { %5634 = vmatpush3.bf16.msra.mxu0 %v6311_v36 }
 0x56f   : > { %5303 = vmatmul.mubr.f32.vlgmr.msra.gmra.mrb[4].mxu0 %v2873_v50  ;;  %v4502_v50 = vmax.f32 %v6253_v34, %v6251_v32 }
 0x576   : > { %v3331_v12 = vpop.xlane.xlu0 %3330 }
 0x577   : > { %v3338_v17 = vmul.f32 0.0078125, %v3331_v12 }
 0x57a   : > { %v3342_v6 = vpop.xlane.xlu0 %3341 }
 0x57c   : > { %v3329_v13 = vpop.xlane.xlu1 %3328 }
 0x57d   : > { %v3337_v15 = vmul.f32 0.0078125, %v3329_v13  ;;  %v3429_v13 = vand.u32 4294901760, %v3428_v2 }
 0x57f   : > { %v3349_v18 = vadd.f32 %v3342_v6, %v3337_v15 }
 0x580   : > { %v3344_v20 = vpop.xlane.xlu1 %3343 }
 0x581   : > { %v3359_v14 = vand.u32 4294901760, %v3349_v18  ;;  %v3350_v21 = vadd.f32 %v3344_v20, %v3338_v17 }
 0x583   : > { %v6338_v22 = vsub.f32 %v3349_v18, %v3359_v14  ;;  %v3362_v23 = vand.u32 4294901760, %v3350_v21 }
 0x585   : > { %v3440_v16 = vand.u32 4294901760, %v6338_v22  ;;  %v6341_v24 = vpack.c.bf16 %v3362_v23, %v3359_v14  ;;  %v6343_v25 = vsub.f32 %v3350_v21, %v3362_v23  ;;  %v3430_v21 = vsub.f32 %v3428_v2, %v3429_v13 }
 0x587   : > { %v3441_v19 = vsub.f32 %v6338_v22, %v3440_v16  ;;  %v3447_v28 = vand.u32 4294901760, %v6343_v25  ;;  %v5648_v29 = vpack.c.bf16 %v6343_v25, %v6338_v22  ;;  %5637 = vmatpush3.bf16.msra.mxu1 %v6341_v24 }
 0x588   : > { %5638 = vmatprep.subr.bf16.mxu1 %v5937_v47 }
 0x589   : > { %v3448_v30 = vsub.f32 %v6343_v25, %v3447_v28  ;;  %v6352_v31 = vpack.c.bf16 %v3447_v28, %v3440_v16  ;;  %v3442_v35 = vand.u32 4294901760, %v3441_v19  ;;  %v3843_v25 = vld [vmem:[%s6528_s13] sm:$0xff] }
 0x58b   : > { %v3449_v33 = vand.u32 4294901760, %v3448_v30 }
 0x58d   : > { %v6354_v36 = vpack.c.bf16 %v3449_v33, %v3442_v35  ;;  %v3431_v33 = vand.u32 4294901760, %v3430_v21 }
 0x642   : > { %v5304_v37 = vpop.f32.mrb[4].mxu0 }
 0x643   : > { %v5683_v38 = vadd.f32 %v5304_v37, %v2786_v10  ;;  %v3312_v39 = vpop.f32.mrb[5].mxu0 }
 0x644   : > { %v5684_v40 = vadd.f32 %v3312_v39, %v2781_v11 }
 0x645   : > { %v3323_v41 = vmax.f32 %v5683_v38, 0.0 }
 0x646   : > { %v3322_v42 = vmax.f32 %v5684_v40, 0.0 }
 0x647   : > { %v3325_v43 = vadd.f32 %v3323_v41, %v6251_v32 }
 0x648   : > { %v3324_v44 = vadd.f32 %v3322_v42, %v6253_v34 }
 0x649   : > { %v6358_v45 = vmax.f32 %v3325_v43, 0.0 }
 0x64a   : > { %v6360_v46 = vmax.f32 %v3324_v44, 0.0 }
 0x64b   : > { %3334 = vadd.xlane.f32.xlu1 %v6358_v45 }
 0x64c   : > { %v4492_v49 = vadd.f32 %v4491_v48, %v6360_v46  ;;  %v4503_v51 = vmax.f32 %v6360_v46, %v6358_v45  ;;  %3332 = vadd.xlane.f32.xlu0 %v6360_v46  ;;  %v3845_v48 = vld [vmem:[%s6528_s13 + $0x10] sm:$0xff] }
 0x64e   : > { %v4493_v52 = vadd.f32 %v4492_v49, %v6358_v45  ;;  %v4504_v53 = vmax.f32 %v4502_v50, %v4503_v51  ;;  %v3859_v50 = vsel %vm3851_vm6, %v3845_v48, 0  ;;  %v3846_v51 = vld [vmem:[%s6528_s13 + $0x18] sm:$0xff] }
 0x64f   : > { %3347 = vmax.xlane.f32.xlu1 %v6358_v45 }
 0x650   : > { %v4494_v54 = vrot.slane %v4493_v52, 4  ;;  %v4505_v55 = vrot.slane %v4504_v53, 4  ;;  %3345 = vmax.xlane.f32.xlu0 %v6360_v46 }
 0x652   : > { %v4495_v56 = vadd.f32 %v4494_v54, %v4493_v52  ;;  %v4506_v57 = vmax.f32 %v4504_v53, %v4505_v55  ;;  %v3954_v53 = vand.u32 4294901760, %v3859_v50  ;;  %v3862_v54 = vsel %vm3851_vm6, %v3846_v51, 0 }
 0x654   : > { %v4496_v58 = vrot.slane %v4495_v56, 2  ;;  %v4507_v59 = vrot.slane %v4506_v57, 2 }
 0x656   : > { %v4497_v60 = vadd.f32 %v4496_v58, %v4495_v56  ;;  %v4508_v61 = vmax.f32 %v4506_v57, %v4507_v59  ;;  %v3964_v56 = vand.u32 4294901760, %v3862_v54  ;;  %v3955_v57 = vsub.f32 %v3859_v50, %v3954_v53 }
 0x658   : > { %v4498_v62 = vrot.slane %v4497_v60, 1  ;;  %v4509_v63 = vrot.slane %v4508_v61, 1  ;;  %v3965_v59 = vsub.f32 %v3862_v54, %v3964_v56 }
 0x65a   : > { %v4499_v0 = vadd.f32 %v4498_v62, %v4497_v60  ;;  %v4510_v3 = vmax.f32 %v4508_v61, %v4509_v63  ;;  %v3956_v60 = vand.u32 4294901760, %v3955_v57  ;;  %v3354_v61 = vld [vmem:[%s6527_s12] sm:$0x3] }
 0x65c   : > { %v4501_v1 = vmul.f32 0.03125, %v4499_v0  ;;  %v3966_v0 = vand.u32 4294901760, %v3965_v59 }
 0x65e   : > { %v6374_v4 = vsel %vm4511_vm4, %v4501_v1, %v4510_v3 }
 0x660   : > { %4533 = vrot.lane.b32.xlu1 %v6374_v4, %s5936_s24  ;;  %s4751_s24 = sld [smem:[#allocation3 + $0x1]] }
 0x664   : > { %4549 = vrot.lane.b32.xlu1 %v6374_v4, %s5934_s22  ;;  %s4513_s22 = sld [smem:[#allocation2]] }
 0x666   : > { %4516 = vrot.lane.b32.xlu0 %v6374_v4, %s5938_s18  ;;  %s4750_s18 = sld [smem:[#allocation3 + $0x80]] }
 0x668   : > { %4597 = vrot.lane.b32.xlu1 %v6374_v4, %s5941_s1  ;;  %s4752_s1 = sld [smem:[#allocation3 + $0x81]] }
 0x66a   : > { %4580 = vrot.lane.b32.xlu0 %v6374_v4, %s5942_s19  ;;  %s4521_s19 = sld [smem:[#allocation3]] }
 0x66e   : > { %4614 = vrot.lane.b32.xlu0 %v6374_v4, %s5943_s23  ;;  %s4754_s23 = sld [smem:[#allocation3 + $0x82]] }
 0x670   : > { %v4522_v54 = vstv %s4521_s19  ;;  %s4757_s19 = sld [smem:[#allocation3 + $0x4]] }
 0x6d8   : > { %v3335_v10 = vpop.xlane.xlu1 %3334 }
 0x6d9   : > { %v3333_v11 = vpop.xlane.xlu0 %3332  ;;  %v3340_v12 = vmul.f32 0.0078125, %v3335_v10 }
 0x6da   : > { %v3339_v15 = vmul.f32 0.0078125, %v3333_v11 }
 0x6dc   : > { %v3348_v6 = vpop.xlane.xlu1 %3347 }
 0x6dd   : > { %v3352_v17 = vadd.f32 %v3348_v6, %v3340_v12  ;;  %v3346_v18 = vpop.xlane.xlu0 %3345 }
 0x6de   : > { %v3351_v20 = vadd.f32 %v3346_v18, %v3339_v15  ;;  %v3847_v18 = vld [vmem:[%s6529_s14] sm:$0xff] }
 0x6df   : > { %v3368_v14 = vand.u32 4294901760, %v3352_v17 }
 0x6e0   : > { %v3365_v23 = vand.u32 4294901760, %v3351_v20  ;;  %v4534_v51 = vpop.permute.xlu1 %4533 }
 0x6e1   : > { %v3460_v16 = vsub.f32 %v3352_v17, %v3368_v14  ;;  %v3848_v17 = vld [vmem:[%s6529_s14 + $0x8] sm:$0xff]  ;;  %v4517_v50 = vpop.permute.xlu0 %4516 }
 0x6e2   : > { %v5639_v19 = vpack.c.bf16 %v3368_v14, %v3365_v23  ;;  %v3453_v28 = vsub.f32 %v3351_v20, %v3365_v23 }
 0x6e3   : > { %v3461_v30 = vand.u32 4294901760, %v3460_v16 }
 0x6e4   : > { %v3454_v35 = vand.u32 4294901760, %v3453_v28  ;;  %5640 = vmatpush3.bf16.msra.mxu1 %v5639_v19 }
 0x6e5   : > { %v3462_v37 = vsub.f32 %v3460_v16, %v3461_v30  ;;  %5641 = vmatprep.subr.bf16.mxu1 %v5937_v47 }
 0x6e6   : > { %v3455_v38 = vsub.f32 %v3453_v28, %v3454_v35  ;;  %v5663_v22 = vpack.c.bf16 %v3461_v30, %v3454_v35 }
 0x6e7   : > { %v3463_v39 = vand.u32 4294901760, %v3462_v37  ;;  %5314 = vmatmul.mubr.f32.vlgmr.msra.gmra.mrb[8].mxu1 %v3431_v33 }
 0x6e8   : > { %v3456_v40 = vand.u32 4294901760, %v3455_v38  ;;  %5643 = vmatpush3.bf16.msra.mxu1 %v6354_v36  ;;  %5324 = vmatprep.mubr.msk.f32.mxu1 %vm5939_vm5, %v5940_v5  ;;  %v5651_v36 = vpack.c.bf16 %v3460_v16, %v3453_v28  ;;  %v3850_v16 = vld [vmem:[%s6529_s14 + $0x18] sm:$0xff]  ;;  %v3849_v28 = vld [vmem:[%s6529_s14 + $0x10] sm:$0xff] }
 0x6e9   : > { %5644 = vmatprep.subr.bf16.mxu1 %v5937_v47 }
 0x6ea   : > { %v5645_v41 = vpack.c.bf16 %v3463_v39, %v3456_v40 }
 0x6ec   : > { %5646 = vmatpush3.bf16.msra.mxu1 %v5645_v41 }
 0x6ed   : > { %5647 = vmatprep.subr.bf16.mxu1 %v5937_v47 }
 0x6ef   : > { %5325 = vmatmul.mubr.f32.vlgmr.msra.gmra.mrb[8].mxu1 %v3427_v9 }
 0x6f0   : > { %5649 = vmatpush3.bf16.msra.mxu1 %v5648_v29  ;;  %5335 = vmatprep.mubr.msk.f32.mxu1 %vm5939_vm5, %v5940_v5  ;;  %v3853_v29 = vsel %vm3851_vm6, %v3843_v25, 0 }
 0x6f1   : > { %5650 = vmatprep.subr.bf16.mxu1 %v5937_v47 }
 0x6f4   : > { %5652 = vmatpush3.bf16.msra.mxu1 %v5651_v36 }
 0x6f5   : > { %5653 = vmatprep.subr.bf16.mxu1 %v5937_v47 }
 0x6f7   : > { %5336 = vmatmul.mubr.f32.vlgmr.msra.gmra.mrb[8].mxu1 %v3428_v2  ;;  %v3967_v2 = vsub.f32 %v3965_v59, %v3966_v0 }
 0x6f8   : > { %5655 = vmatpush3.bf16.msra.mxu1 %v6341_v24  ;;  %5346 = vmatprep.mubr.msk.f32.mxu1 %vm5939_vm5, %v5940_v5 }
 0x6f9   : > { %5656 = vmatprep.subr.bf16.mxu1 %v5937_v47  ;;  %v3968_v12 = vand.u32 4294901760, %v3967_v2  ;;  %v4572_v2 = vstv %s4756_s25 }
 0x6fc   : > { %5658 = vmatpush3.bf16.msra.mxu1 %v5639_v19 }
 0x6fd   : > { %5659 = vmatprep.subr.bf16.mxu1 %v5937_v47 }
 0x6ff   : > { %5347 = vmatmul.mubr.f32.vlgmr.msra.gmra.mrb[8].mxu1 %v3429_v13 }
 0x700   : > { %5661 = vmatpush3.bf16.msra.mxu1 %v6352_v31  ;;  %5357 = vmatprep.mubr.msk.f32.mxu1 %vm5939_vm5, %v5940_v5  ;;  %v6420_v31 = vand.u32 4294901760, %v3853_v29 }
 0x701   : > { %5662 = vmatprep.subr.bf16.mxu1 %v5937_v47 }
 0x702   : > { %v3935_v42 = vsub.f32 %v3853_v29, %v6420_v31 }
 0x704   : > { %5664 = vmatpush3.bf16.msra.mxu1 %v5663_v22  ;;  %v3936_v43 = vand.u32 4294901760, %v3935_v42 }
 0x705   : > { %5665 = vmatprep.subr.bf16.mxu1 %v5937_v47 }
 0x706   : > { %v3937_v44 = vsub.f32 %v3935_v42, %v3936_v43 }
 0x707   : > { %5358 = vmatmul.mubr.f32.vlgmr.msra.gmra.mrb[8].mxu1 %v3427_v9 }
 0x708   : > { %5667 = vmatpush3.bf16.msra.mxu1 %v6341_v24  ;;  %5368 = vmatprep.mubr.msk.f32.mxu1 %vm5939_vm5, %v5940_v5  ;;  %v3938_v24 = vand.u32 4294901760, %v3937_v44  ;;  %v3957_v5 = vsub.f32 %v3955_v57, %v3956_v60 }
 0x709   : > { %5668 = vmatprep.subr.bf16.mxu1 %v5937_v47  ;;  %v3844_v47 = vld [vmem:[%s6528_s13 + $0x8] sm:$0xff] }
 0x70a   : > { %5373 = vmatprep.mubr.f32.mxu0 %v3938_v24  ;;  %v3856_v49 = vsel %vm3851_vm6, %v3844_v47, 0  ;;  %v3958_v10 = vand.u32 4294901760, %v3957_v5 }
 0x70b   : > { %v3944_v52 = vand.u32 4294901760, %v3856_v49 }
 0x70c   : > { %5670 = vmatpush3.bf16.msra.mxu1 %v5639_v19 }
 0x70d   : > { %v3945_v55 = vsub.f32 %v3856_v49, %v3944_v52  ;;  %v4525_v49 = vstv %s4750_s18  ;;  %s4760_s18 = sld [smem:[#allocation3 + $0x85]] }
 0x70f   : > { %5369 = vmatmul.mubr.f32.vlgmr.msra.gmra.mrb[8].mxu1 %v3427_v9  ;;  %v3946_v58 = vand.u32 4294901760, %v3945_v55 }
 0x711   : > { %v3947_v63 = vsub.f32 %v3945_v55, %v3946_v58 }
 0x713   : > { %v3948_v9 = vand.u32 4294901760, %v3947_v63 }
 0x7e2   : > { %v3839_v62 = vpop.f32.mrb[8].mxu1 }
 0x7e3   : > { %v5685_v1 = vadd.f32 %v3839_v62, %v3354_v61  ;;  %v5370_v3 = vpop.f32.mrb[9].mxu1  ;;  %v4538_v62 = vstv %s4751_s24  ;;  %s4759_s24 = sld [smem:[#allocation3 + $0x5]] }
 0x7e4   : > { %v4514_v3 = vstv %s4513_s22 }
 0x7e5   : > { %v3866_v7 = vsel %vm3864_vm7, %v5685_v1, 0  ;;  %v4539_v1 = vmul.f32 %v4538_v62, %v4534_v51 }
 0x7e6   : > { %v3869_v8 = vand.u32 4294901760, %v3866_v7 }
 0x7e8   : > { %v3976_v11 = vsub.f32 %v3866_v7, %v3869_v8  ;;  %5371 = vmatprep.subr.mxu0 %v3869_v8 }
 0x7e9   : > { %5372 = vmatpush3.msra.mxu0 %v3869_v8 }
 0x7ea   : > { %5374 = vmatmul.mubr.f32.vlgmr.msra.gmra.mrb[6].mxu0 %v3948_v9  ;;  %v3977_v13 = vand.u32 4294901760, %v3976_v11 }
 0x7eb   : > { %5376 = vmatprep.mubr.f32.mxu0 %v3958_v10 }
 0x7ec   : > { %v3978_v15 = vsub.f32 %v3976_v11, %v3977_v13 }
 0x7ee   : > { %5377 = vmatmul.mubr.f32.gmra.mrb[8].mxu0 %v3968_v12  ;;  %v3979_v6 = vand.u32 4294901760, %v3978_v15  ;;  %v4581_v12 = vpop.permute.xlu0 %4580  ;;  %v4573_v15 = vmul.f32 %v4572_v2, %v6374_v4 }
 0x7ef   : > { %5381 = vmatprep.mubr.f32.mxu0 %v6420_v31 }
 0x7f0   : > { %5379 = vmatprep.subr.mxu0 %v3979_v6 }
 0x7f1   : > { %5380 = vmatpush3.msra.mxu0 %v3979_v6 }
 0x7f2   : > { %5382 = vmatmul.mubr.f32.vlgmr.msra.gmra.mrb[6].mxu0 %v3944_v52  ;;  %5387 = vmatprep.subr.mxu0 %v3976_v11 }
 0x7f3   : > { %5388 = vmatpush3.msra.mxu0 %v3976_v11  ;;  %5384 = vmatprep.mubr.f32.mxu0 %v3954_v53  ;;  %v4589_v11 = vstv %s4758_s2  ;;  %s4761_s2 = sld [smem:[#allocation3 + $0x6]] }
 0x7f4   : > { %5395 = vmatprep.subr.mxu0 %v3869_v8 }
 0x7f6   : > { %5385 = vmatmul.mubr.f32.gmra.mrb[8].mxu0 %v3964_v56 }
 0x7f7   : > { %5389 = vmatprep.mubr.f32.mxu0 %v3935_v42 }
 0x7fa   : > { %5390 = vmatmul.mubr.f32.vlgmr.msra.gmra.mrb[6].mxu0 %v3945_v55 }
 0x7fb   : > { %5396 = vmatpush3.msra.mxu0 %v3869_v8  ;;  %5392 = vmatprep.mubr.f32.mxu0 %v3955_v57  ;;  %v4550_v57 = vpop.permute.xlu1 %4549 }
 0x7fc   : > { %5403 = vmatprep.subr.mxu0 %v3977_v13 }
 0x7fe   : > { %5393 = vmatmul.mubr.f32.gmra.mrb[8].mxu0 %v3965_v59  ;;  %v4523_v59 = vmul.f32 %v4522_v54, %v4517_v50 }
 0x7ff   : > { %5397 = vmatprep.mubr.f32.mxu0 %v3936_v43 }
 0x802   : > { %5398 = vmatmul.mubr.f32.vlgmr.msra.gmra.mrb[6].mxu0 %v3946_v58 }
 0x803   : > { %5404 = vmatpush3.msra.mxu0 %v3977_v13  ;;  %5400 = vmatprep.mubr.f32.mxu0 %v3956_v60 }
 0x804   : > { %5411 = vmatprep.subr.mxu0 %v3869_v8 }
 0x806   : > { %5401 = vmatmul.mubr.f32.gmra.mrb[8].mxu0 %v3966_v0  ;;  %v4554_v0 = vstv %s4753_s0  ;;  %s554_s0 = sand.u32 1, %s5923_s27  }
 0x807   : > { %5405 = vmatprep.mubr.f32.mxu0 %v6420_v31  ;;  %v4555_v9 = vmul.f32 %v4554_v0, %v4550_v57  ;;  %s4743_s22 = sshll.u32 %s554_s0, 5 }
 0x808   : > { %s556_s25 = scalar_lea.vmem [#allocation6], %s4743_s22  ;;  %s5944_s22 = smov [#allocation6]  }
 0x809   : > { %s5869_s3 = sshll.u32 %s5944_s22, 4  ;;  %s5870_s3 = int_to_ptr.vmem [resolvable:$false] %s5869_s3 }
 0x80a   : > { %5406 = vmatmul.mubr.f32.vlgmr.msra.gmra.mrb[6].mxu0 %v3944_v52  ;;  %s5871_s4 = scalar_lea.vmem %s5870_s3, 1024 }
 0x80b   : > { %5412 = vmatpush3.msra.mxu0 %v3869_v8  ;;  %5408 = vmatprep.mubr.f32.mxu0 %v3954_v53 }
 0x80e   : > { %5409 = vmatmul.mubr.f32.gmra.mrb[8].mxu0 %v3964_v56 }
 0x80f   : > { %5413 = vmatprep.mubr.f32.mxu0 %v6420_v31 }
 0x812   : > { %5414 = vmatmul.mubr.f32.vlgmr.msra.gmra.mrb[6].mxu0 %v3944_v52  ;;  %v4526_v52 = vmul.f32 %v4525_v49, %v4517_v50 }
 0x813   : > { %5416 = vmatprep.mubr.f32.mxu0 %v3954_v53  ;;  %v4541_v53 = vstv %s4752_s1  ;;  %s4755_s1 = sld [smem:[#allocation3 + $0x3]] }
 0x814   : > { %v4528_v55 = vrot.slane %v4526_v52, 1  ;;  %v4542_v58 = vmul.f32 %v4541_v53, %v4534_v51 }
 0x816   : > { %5417 = vmatmul.mubr.f32.gmra.mrb[8].mxu0 %v3964_v56  ;;  %v4557_v56 = vstv %s4754_s23  ;;  %v4530_v60 = vadd.f32 %v4528_v55, %v4523_v59  ;;  %v4544_v63 = vrot.slane %v4542_v58, 1  ;;  %s4762_s23 = sld [smem:[#allocation3 + $0x86]] }
 0x817   : > { %v4558_v61 = vmul.f32 %v4557_v56, %v4550_v57  ;;  %v4638_v56 = vshrl.u32 %v564_v26, 7 }
 0x818   : > { %v4531_v5 = vsel %vm4518_vm8, %v4530_v60, 0.0  ;;  %v4546_v8 = vadd.f32 %v4544_v63, %v4539_v1 }
 0x819   : > { %v4560_v7 = vrot.slane %v4558_v61, 1  ;;  %v4532_v10 = vadd.f32 %v4531_v5, %v4514_v3  ;;  %v4639_v57 = vsub.s32 0, %v4638_v56 }
 0x81a   : > { %v4547_v6 = vsel %vm2209_vm3, %v4546_v8, 0.0 }
 0x81b   : > { %v4562_v13 = vadd.f32 %v4560_v7, %v4555_v9 }
 0x8e5   : > { %v5415_v20 = vpop.f32.mrb[6].mxu0 }
 0x8e6   : > { %v5686_v14 = vadd.f32 %v5415_v20, %v3848_v17  ;;  %v4421_v21 = vpop.f32.mrb[7].mxu0  ;;  %v4590_v17 = vmul.f32 %v4589_v11, %v4581_v12  ;;  %v4606_v20 = vstv %s4760_s18  ;;  %s4663_s18 = sshll.u32 %s556_s25, 4  ;;  %s6467_s18 = int_to_ptr.vmem [resolvable:$true] %s4663_s18 }
 0x8e7   : > { %v5687_v23 = vadd.f32 %v4421_v21, %v3847_v18  ;;  %v4548_v18 = vadd.f32 %v4547_v6, %v4532_v10  ;;  %v4563_v21 = vsel %vm566_vm1, %v4562_v13, 0.0  ;;  %p5872_p13 = scmp.lt.s32.totalorder %s6467_s18, %s5870_s3 }
 0x8e8   : > { %v4747_v19 = vmul.f32 -1.442695, %v5686_v14  ;;  %v4598_v14 = vpop.permute.xlu1 %4597 }
 0x8e9   : > { %v4746_v30 = vmul.f32 -1.442695, %v5687_v23  ;;  %v5418_v33 = vpop.f32.mrb[8].mxu0  ;;  %v4569_v23 = vstv %s4755_s1  ;;  %s4770_s1 = sshll.u32 %s6061_s16, 9  ;;  %s5865_s16 = scalar_lea.vmem %s6467_s18, 512 }
 0x8ea   : > { %5830 = vpow2.f32 %v4747_v19  ;;  %v5688_v35 = vadd.f32 %v5418_v33, %v3850_v16  ;;  %v4433_v37 = vpop.f32.mrb[9].mxu0  ;;  %v4586_v16 = vstv %s4757_s19  ;;  %v4575_v19 = vrot.slane %v4573_v15, 1  ;;  %p5866_p9 = scmp.ne.s32.totalorder %s6467_s18, %s5865_s16  ;;  %p5873_p0 = scmp.lt.s32.totalorder %s5871_s4, %s5865_s16 }
 0x8eb   : > { %5832 = vpow2.f32 %v4746_v30  ;;  %v5689_v38 = vadd.f32 %v4433_v37, %v3849_v28  ;;  %v4592_v28 = vrot.slane %v4590_v17, 1  ;;  %v4607_v30 = vmul.f32 %v4606_v20, %v4598_v14 }
 0x8ec   : > { %v4749_v39 = vmul.f32 -1.442695, %v5688_v35  ;;  %v4564_v33 = vadd.f32 %v4563_v21, %v4548_v18  ;;  %v4570_v35 = vmul.f32 %v4569_v23, %v6374_v4  ;;  %v4623_v37 = vstv %s4762_s23  ;;  %p5867_p10 = pnand %p5866_p9, %p6078_p5  ;;  %p5874_p1 = por %p5873_p0, %p5872_p13 }
 0x8ed   : > { %v4748_v40 = vmul.f32 -1.442695, %v5689_v38  ;;  %v4615_v38 = vpop.permute.xlu0 %4614 }
 0x8ee   : > { %5834 = vpow2.f32 %v4749_v39  ;;  %v4587_v39 = vmul.f32 %v4586_v16, %v4581_v12  ;;  %p5868_p12 = pneg %p5867_p10 }
 0x8ef   : > { %5836 = vpow2.f32 %v4748_v40  ;;  %v4577_v40 = vadd.f32 %v4575_v19, %v4570_v35 }
 0x8f0   : > { %p5875_p2 = pnand %p5874_p1, %p5868_p12 }
 0x8f4   : > { %v5831_v41 = vpop.eup %5830 }
 0x8f5   : > { %v5833_v36 = vpop.eup %5832  ;;  %v4456_v22 = vadd.f32 1.0, %v5831_v41  ;;  %v4603_v41 = vstv %s4759_s24  ;;  %s6472_s24 = scalar_lea.hbm %s6532_s17, %s4770_s1 }
 0x8f6   : > { %v4455_v25 = vadd.f32 1.0, %v5833_v36  ;;  %v4594_v36 = vadd.f32 %v4592_v28, %v4587_v39 }
 0x8f7   : > { %5838 = vrcp.f32 %v4456_v22  ;;  %v4609_v22 = vrot.slane %v4607_v30, 1 }
 0x8f8   : > { %v5835_v29 = vpop.eup %5834  ;;  %5840 = vrcp.f32 %v4455_v25  ;;  %v4624_v25 = vmul.f32 %v4623_v37, %v4615_v38 }
 0x8f9   : > { %v5837_v31 = vpop.eup %5836  ;;  %v4458_v42 = vadd.f32 1.0, %v5835_v29  ;;  %v4579_v29 = vadd.f32 %v4577_v40, %v4564_v33 }
 0x8fa   : > { %v4457_v43 = vadd.f32 1.0, %v5837_v31  ;;  %v4604_v31 = vmul.f32 %v4603_v41, %v4598_v14 }
 0x8fb   : > { %5842 = vrcp.f32 %v4458_v42  ;;  %v4620_v42 = vstv %s4761_s2  ;;  %s6474_s2 = scalar_lea.sflag [#allocation4], %s554_s0 }
 0x8fc   : > { %5844 = vrcp.f32 %v4457_v43  ;;  %v4595_v43 = vsel %vm4583_vm9, %v4594_v36, 0.0  ;;  %v4621_v4 = vmul.f32 %v4620_v42, %v4615_v38 }
 0x901   : > { %v5839_v44 = vpop.eup %5838 }
 0x902   : > { %v5841_v24 = vpop.eup %5840  ;;  %4474 = vperm.xlu0 %5829, %v5839_v44   ;;  %v4611_v44 = vadd.f32 %v4609_v22, %v4604_v31 }
 0x903   : > { %4469 = vperm.xlu1 %5828, %v5841_v24   ;;  %v4626_v24 = vrot.slane %v4624_v25, 1 }
 0x905   : > { %v5843_v47 = vpop.eup %5842  ;;  %v4628_v49 = vadd.f32 %v4626_v24, %v4621_v4 }
 0x906   : > { %v5845_v48 = vpop.eup %5844  ;;  %4484 = vperm.xlu0 %5829, %v5843_v47   ;;  %v4596_v47 = vadd.f32 %v4595_v43, %v4579_v29 }
 0x907   : > { %4479 = vperm.xlu1 %5828, %v5845_v48   ;;  %v4612_v48 = vsel %vm4600_vm10, %v4611_v44, 0.0  ;;  %v4629_v51 = vsel %vm4617_vm11, %v4628_v49, 0.0 }
 0x908   : > { %v4613_v50 = vadd.f32 %v4612_v48, %v4596_v47 }
 0x90a   : > { %v4630_v52 = vadd.f32 %v4629_v51, %v4613_v50 }
 0x90c   : > { %v4763_v53 = vmul.f32 -1.442695, %v4630_v52 }
 0x90e   : > { %5846 = vpow2.f32 %v4763_v53 }
 0x918   : > { %v5847_v54 = vpop.eup %5846 }
 0x919   : > { %v4634_v55 = vadd.f32 1.0, %v5847_v54 }
 0x91b   : > { %5848 = vrcp.f32 %v4634_v55 }
 0x925   : > { %v5849_v58 = vpop.eup %5848 }
 0x926   : > { %v4640_v61 = vrot.slane %v5849_v58, %v4639_v57 }
 0x981   : > { %v4475_v59 = vpop.permute.xlu0 %4474 }
 0x982   : > { %v4488_v60 = vmul.f32 %v4475_v59, %v6251_v32  ;;  %v4470_v62 = vpop.permute.xlu1 %4469 }
 0x983   : > { %v4487_v27 = vmul.f32 %v4470_v62, %v6253_v34 }
 0x984   : > { %v4642_v63 = vmul.f32 %v4640_v61, %v4488_v60 }
 0x985   : > { %v4641_v0 = vmul.f32 %v4640_v61, %v4487_v27  ;;  %v4485_v1 = vpop.permute.xlu0 %4484 }
 0x986   : > { %4646 = vst [vmem:[%s556_s25 + $0x8] sm:$0xff] %v4642_v63  ;;  %v4490_v26 = vmul.f32 %v4485_v1, %v6358_v45  ;;  %v4480_v3 = vpop.permute.xlu1 %4479 }
 0x987   : > { %4645 = vst [vmem:[%s556_s25] sm:$0xff] %v4641_v0  ;;  %v4489_v5 = vmul.f32 %v4480_v3, %v6360_v46 }
 0x988   : > { %v4644_v32 = vmul.f32 %v4640_v61, %v4490_v26 }
 0x989   : > { %v4643_v34 = vmul.f32 %v4640_v61, %v4489_v5 }
 0x98a   : > { %4648 = vst [vmem:[%s556_s25 + $0x18] sm:$0xff] %v4644_v32 }
 0x98b   : > { %4647 = vst [vmem:[%s556_s25 + $0x10] sm:$0xff] %v4643_v34 }
 0x98c   : > { %5878 = shalt.err (!%p5875_p2)
}
 0x98d   : > { %s5879_s0 = scalar_lea.hbm %s6472_s24, 512  ;;  %s5883_s19 = scalar_lea.hbm %s6532_s17, 1024 }
 0x98e   : > { %p5880_p3 = scmp.ne.s32.totalorder %s6472_s24, %s5879_s0  ;;  %p5884_p8 = scmp.lt.u32.totalorder %s6472_s24, %s6532_s17 }
 0x98f   : > { %p5885_p11 = scmp.lt.u32.totalorder %s5883_s19, %s5879_s0  ;;  %p5887_p10 = scmp.lt.u32.totalorder %s5879_s0, %s6472_s24 }
 0x990   : > { %p5881_p4 = pnand %p5880_p3, %p6078_p5 }
 0x991   : > { %p5886_p9 = por %p5885_p11, %p5884_p8 }
 0x992   : > { %p5882_p7 = pneg %p5881_p4 }
 0x993   : > { %p5888_p12 = por %p5887_p10, %p5886_p9 }
 0x995   : > { %p5889_p13 = pnand %p5888_p12, %p5882_p7 }
 0x997   : > { %5892 = shalt.err (!%p5889_p13)
}
 0x998   : > { %s5945_s4 = smov 128   ;;  %s5946_s16 = smov 8  }
 0x999   : > { %5770 = dma.vmem_to_hbm [thread:$0]  (%p6078_p5), %s6467_s18, 512, %s6472_s24, %s6474_s2, %s5945_s4, %s5945_s4, %s5946_s16  }
 0x99a PF: > { %p5782_p0 = scmp.ge.s32.totalorder %s5931_s29, 2  ;;  %s4678_s22 = sand.u32 1, %s5919_s26  }
 0x99b   : > { %s4679_s0 = scalar_lea.sflag [#allocation4], %s4678_s22 }
 0x99c   : > { %p5777_p1 = pnand %p5782_p0, %p6082_p6 }
 0x99e   : > { %5914 = dma.done.wait (!%p5777_p1), %s4679_s0, 512  }
 0x99f   : > { %5916 = vsyncadd (!%p5777_p1), %s4679_s0, 4294966784  ;;  %s6550_s25 = sld [smem:[#allocation9_spill]]  ;;  %p29_p2 = scmp.ge.s32.totalorder %s6065_s30, 4  }
 0x9a0   : > { %s6551_s26 = smov %s5923_s27  ;;  %s6552_s27 = smov %s5927_s28 }
 0x9a1   : > { %s6554_s29 = smov %s6065_s30  ;;  %31 = sbr.rel (!%p29_p2) target bundleno = 12 (0xc), region = 128 }
 0x9a5   : > { %s6553_s28 = smov %s6550_s25 }
 0x9a8   :  { %4684 = vsyncpa [#allocation4], 1 }
 0x9a9   :  { %4686 = vsyncpa [#allocation4 + $0x1], 1 }
 0x9aa   :  { %4687 = vsyncpa [#allocation5], 1 }
 0x9ab   :  { %4689 = vsyncpa [#allocation5 + $0x1], 1 }

</bundles_post_ra>
